<compile_context>
chip_gen: v5e
topology: v5e:2x2
jax: 0.10.0
libtpu: 0.0.40
codegen_flags: <defaults>
</compile_context>

<pallas_src>
import math
import functools

import numpy as np
import jax
import jax.numpy as jnp
from jax.experimental import pallas as pl
from jax.experimental.pallas import tpu as pltpu  # noqa: F401  (kept for CompilerParams if scaled up)

CFG = dict(
    vocab_size=128,
    context_length=16,
    emb_dim=32,
    n_heads=4,
    n_layers=2,
    drop_rate=0.0,
    qkv_bias=False,
)


# ----------------------------- shared math helpers -----------------------------
def _layernorm(x, scale, shift, eps=1e-5):
    # matches torch: mean / var(unbiased=False) over last dim
    mean = jnp.mean(x, axis=-1, keepdims=True)
    var = jnp.mean((x - mean) ** 2, axis=-1, keepdims=True)
    return (x - mean) / jnp.sqrt(var + eps) * scale + shift


def _gelu(x):
    return x * 0.5 * (1.0 + jnp.tanh(math.sqrt(2.0 / math.pi) *
                                     (x + 0.044715 * x ** 3)))


# ----------------------------- fused Pallas kernel -----------------------------
def fused_forward_kernel(x_ref, mask_ref, lnb_ref, wqkv_ref, wo_ref,
                         w1_ref, b1_ref, w2_ref, fln_ref, wout_ref,
                         out_ref, *, n_layers, n_heads):
    D = x_ref.shape[-1]
    hd = D // n_heads
    inv_sqrt_hd = 1.0 / math.sqrt(hd)

    x = x_ref[...]                       # (B*T, D) f32, stays in registers/VMEM
    mask = mask_ref[...]                 # (B*T, B*T) additive mask: 0 / -1e30

    for l in range(n_layers):            # static layer loop, weights stay resident
        lnp = lnb_ref[l]                 # (6, D): ln1_s, ln1_b, ln2_s, ln2_b, bo, b2
        ln1_s, ln1_b = lnp[0:1], lnp[1:2]
        ln2_s, ln2_b = lnp[2:3], lnp[3:4]
        bo, b2 = lnp[4:5], lnp[5:6]
        wqkv = wqkv_ref[l]               # (D, 3D)
        wo = wo_ref[l]                   # (D, D)
        w1 = w1_ref[l]                   # (D, 4D)
        b1 = b1_ref[l]                   # (1, 4D)
        w2 = w2_ref[l]                   # (4D, D)

        # ---- attention branch ----
        xn = _layernorm(x, ln1_s, ln1_b)
        qkv = jnp.dot(xn, wqkv, preferred_element_type=jnp.float32)   # (BT, 3D)
        q, k, v = qkv[:, :D], qkv[:, D:2 * D], qkv[:, 2 * D:]

        ctx_heads = []
        for h in range(n_heads):         # static head loop (lane slices, hd = 8)
            cs = slice(h * hd, (h + 1) * hd)
            qh, kh, vh = q[:, cs], k[:, cs], v[:, cs]
            s = jnp.dot(qh, kh.T, preferred_element_type=jnp.float32) * inv_sqrt_hd
            s = s + mask                              # block-diag causal mask
            s = s - jnp.max(s, axis=-1, keepdims=True)
            e = jnp.exp(s)
            inv_den = pl.reciprocal(jnp.sum(e, axis=-1, keepdims=True), approx=True)
            p = e * inv_den
            ctx_heads.append(jnp.dot(p, vh, preferred_element_type=jnp.float32))
        ctx = jnp.concatenate(ctx_heads, axis=-1)     # (BT, D)

        x = x + jnp.dot(ctx, wo, preferred_element_type=jnp.float32) + bo

        # ---- feed-forward branch ----
        xn2 = _layernorm(x, ln2_s, ln2_b)
        h1 = _gelu(jnp.dot(xn2, w1, preferred_element_type=jnp.float32) + b1)
        x = x + jnp.dot(h1, w2, preferred_element_type=jnp.float32) + b2

    # ---- final LayerNorm + vocab head (V = 128 -> lane-dense stores) ----
    fln = fln_ref[...]                                # (2, D)
    xn = _layernorm(x, fln[0:1], fln[1:2])
    out_ref[...] = jnp.dot(xn, wout_ref[...],
                           preferred_element_type=jnp.float32).astype(out_ref.dtype)


# ----------------------------- wrapper -----------------------------
def _block_causal_mask(B, T):
    # Additive mask: 0 where row may attend to col (same batch element, col <= row),
    # -1e30 otherwise.  Built host-side; avoids vector integer division in-kernel.
    r = np.arange(B * T)
    allow = (r[:, None] // T == r[None, :] // T) & (r[:, None] >= r[None, :])
    return jnp.asarray(np.where(allow, 0.0, -1e30), dtype=jnp.float32)


def model_forward(in_idx, params, cfg):
    B, T = in_idx.shape
    D, V = cfg['emb_dim'], cfg['vocab_size']
    # embedding gather + positional add stays in plain JAX (glue)
    x = (params['tok_emb'][in_idx] + params['pos_emb'][:T]).reshape(B * T, D)
    mask = _block_causal_mask(B, T)

    kernel = functools.partial(fused_forward_kernel,
                               n_layers=cfg['n_layers'], n_heads=cfg['n_heads'])
    # Single pallas_call, no grid: all operands fully resident in VMEM.
    # TODO(synk): for realistic model sizes (D >= 768) tile the FF weights along the
    # 4D axis and set pltpu.CompilerParams(vmem_limit_bytes=...) (v7x has 64 MiB VMEM).
    logits = pl.pallas_call(
        kernel,
        out_shape=jax.ShapeDtypeStruct((B * T, V), jnp.float32),
    )(x, mask, params['lnb'], params['wqkv'], params['wo'],
      params['w1'], params['b1'], params['w2'], params['fln'], params['w_out'])
    return logits.reshape(B, T, V)


# ----------------------------- parameter init -----------------------------
def init_params(cfg, key):
    D, V, C, L = cfg['emb_dim'], cfg['vocab_size'], cfg['context_length'], cfg['n_layers']
    F = 4 * D
    ks = jax.random.split(key, 7)
    nrm = lambda k, shape: (0.02 * jax.random.normal(k, shape)).astype(jnp.float32)

    # packed per-layer small params: rows = [ln1_s, ln1_b, ln2_s, ln2_b, bo, b2]
    lnb = jnp.zeros((L, 6, D), jnp.float32)
    lnb = lnb.at[:, 0].set(1.0).at[:, 2].set(1.0)

    return dict(
        tok_emb=nrm(ks[0], (V, D)),
        pos_emb=nrm(ks[1], (C, D)),
        lnb=lnb,
        wqkv=nrm(ks[2], (L, D, 3 * D)),      # [wq | wk | wv] stacked along last dim
        wo=nrm(ks[3], (L, D, D)),
        w1=nrm(ks[4], (L, D, F)),
        b1=jnp.zeros((L, 1, F), jnp.float32),
        w2=nrm(ks[5], (L, F, D)),
        fln=jnp.concatenate([jnp.ones((1, D)), jnp.zeros((1, D))], axis=0).astype(jnp.float32),
        w_out=nrm(ks[6], (D, V)),
    )


# ----------------------------- pure-JAX reference -----------------------------
def ref_forward(in_idx, params, cfg):
    B, T = in_idx.shape
    D, H, L = cfg['emb_dim'], cfg['n_heads'], cfg['n_layers']
    hd = D // H
    x = params['tok_emb'][in_idx] + params['pos_emb'][:T]
    causal = jnp.tril(jnp.ones((T, T), bool))
    for l in range(L):
        lnp = params['lnb'][l]
        ln1_s, ln1_b, ln2_s, ln2_b, bo, b2 = [lnp[i] for i in range(6)]
        wq, wk, wv = jnp.split(params['wqkv'][l], 3, axis=-1)
        wo, w1, b1, w2 = params['wo'][l], params['w1'][l], params['b1'][l], params['w2'][l]

        xn = _layernorm(x, ln1_s, ln1_b)
        q = (xn @ wq).reshape(B, T, H, hd).transpose(0, 2, 1, 3)
        k = (xn @ wk).reshape(B, T, H, hd).transpose(0, 2, 1, 3)
        v = (xn @ wv).reshape(B, T, H, hd).transpose(0, 2, 1, 3)
        s = jnp.einsum('bhtd,bhsd->bhts', q, k) / math.sqrt(hd)
        s = jnp.where(causal, s, -1e30)
        w = jax.nn.softmax(s, axis=-1)
        ctx = jnp.einsum('bhts,bhsd->bhtd', w, v).transpose(0, 2, 1, 3).reshape(B, T, D)
        x = x + ctx @ wo + bo

        xn2 = _layernorm(x, ln2_s, ln2_b)
        x = x + _gelu(xn2 @ w1 + b1) @ w2 + b2
    x = _layernorm(x, params['fln'][0], params['fln'][1])
    return x @ params['w_out']


# ----------------------------- main -----------------------------
if __name__ == "__main__":
    key = jax.random.PRNGKey(0)
    pkey, ikey = jax.random.split(key)
    params = init_params(CFG, pkey)

    B, T = 2, 8
    in_idx = jax.random.randint(ikey, (B, T), 0, CFG['vocab_size'], dtype=jnp.int32)

    fwd = jax.jit(lambda idx, p: model_forward(idx, p, CFG))
    logits = jax.block_until_ready(fwd(in_idx, params))

    expected = ref_forward(in_idx, params, CFG)
    assert logits.shape == (B, T, CFG['vocab_size'])
    # tolerance slightly relaxed vs strict f32 because the softmax denominator uses
    # the approximate EUP reciprocal (pl.reciprocal(..., approx=True)).
    assert jnp.allclose(logits, expected, rtol=1e-2, atol=2e-3), (
        "mismatch vs JAX reference: max abs diff "
        f"{float(jnp.max(jnp.abs(logits - expected)))}")

    print("KERNEL_OK")
</pallas_src>

<mosaic_0001>
module attributes {stable_mosaic.version = 11 : i64} {
  func.func @fused_forward_kernel(%arg0: memref<16x32xf32, #tpu.memory_space<vmem>>, %arg1: memref<16x16xf32, #tpu.memory_space<vmem>>, %arg2: memref<2x6x32xf32, #tpu.memory_space<vmem>>, %arg3: memref<2x32x96xf32, #tpu.memory_space<vmem>>, %arg4: memref<2x32x32xf32, #tpu.memory_space<vmem>>, %arg5: memref<2x32x128xf32, #tpu.memory_space<vmem>>, %arg6: memref<2x1x128xf32, #tpu.memory_space<vmem>>, %arg7: memref<2x128x32xf32, #tpu.memory_space<vmem>>, %arg8: memref<2x32xf32, #tpu.memory_space<vmem>>, %arg9: memref<32x128xf32, #tpu.memory_space<vmem>>, %arg10: memref<16x128xf32, #tpu.memory_space<vmem>>) attributes {dimension_semantics = [], scalar_prefetch = 0 : i64, scratch_operands = 0 : i64, tpu.core_type = #tpu.core_type<tc>} {
    %c0 = arith.constant 0 : index
    %c0_0 = arith.constant 0 : index
    %0 = vector.load %arg0[%c0, %c0_0] : memref<16x32xf32, #tpu.memory_space<vmem>>, vector<16x32xf32>
    %c0_1 = arith.constant 0 : index
    %c0_2 = arith.constant 0 : index
    %1 = vector.load %arg1[%c0_1, %c0_2] : memref<16x16xf32, #tpu.memory_space<vmem>>, vector<16x16xf32>
    %c0_3 = arith.constant 0 : index
    %c0_4 = arith.constant 0 : index
    %c0_5 = arith.constant 0 : index
    %2 = vector.load %arg2[%c0_3, %c0_4, %c0_5] : memref<2x6x32xf32, #tpu.memory_space<vmem>>, vector<1x6x32xf32>
    %3 = vector.shape_cast %2 : vector<1x6x32xf32> to vector<6x32xf32>
    %4 = vector.extract_strided_slice %3 {offsets = [0, 0], sizes = [1, 32], strides = [1, 1]} : vector<6x32xf32> to vector<1x32xf32>
    %5 = vector.extract_strided_slice %3 {offsets = [1, 0], sizes = [1, 32], strides = [1, 1]} : vector<6x32xf32> to vector<1x32xf32>
    %6 = vector.extract_strided_slice %3 {offsets = [2, 0], sizes = [1, 32], strides = [1, 1]} : vector<6x32xf32> to vector<1x32xf32>
    %7 = vector.extract_strided_slice %3 {offsets = [3, 0], sizes = [1, 32], strides = [1, 1]} : vector<6x32xf32> to vector<1x32xf32>
    %8 = vector.extract_strided_slice %3 {offsets = [4, 0], sizes = [1, 32], strides = [1, 1]} : vector<6x32xf32> to vector<1x32xf32>
    %9 = vector.extract_strided_slice %3 {offsets = [5, 0], sizes = [1, 32], strides = [1, 1]} : vector<6x32xf32> to vector<1x32xf32>
    %c0_6 = arith.constant 0 : index
    %c0_7 = arith.constant 0 : index
    %c0_8 = arith.constant 0 : index
    %10 = vector.load %arg3[%c0_6, %c0_7, %c0_8] : memref<2x32x96xf32, #tpu.memory_space<vmem>>, vector<1x32x96xf32>
    %11 = vector.shape_cast %10 : vector<1x32x96xf32> to vector<32x96xf32>
    %c0_9 = arith.constant 0 : index
    %c0_10 = arith.constant 0 : index
    %c0_11 = arith.constant 0 : index
    %12 = vector.load %arg4[%c0_9, %c0_10, %c0_11] : memref<2x32x32xf32, #tpu.memory_space<vmem>>, vector<1x32x32xf32>
    %13 = vector.shape_cast %12 : vector<1x32x32xf32> to vector<32x32xf32>
    %c0_12 = arith.constant 0 : index
    %c0_13 = arith.constant 0 : index
    %c0_14 = arith.constant 0 : index
    %14 = vector.load %arg5[%c0_12, %c0_13, %c0_14] : memref<2x32x128xf32, #tpu.memory_space<vmem>>, vector<1x32x128xf32>
    %15 = vector.shape_cast %14 : vector<1x32x128xf32> to vector<32x128xf32>
    %c0_15 = arith.constant 0 : index
    %c0_16 = arith.constant 0 : index
    %c0_17 = arith.constant 0 : index
    %16 = vector.load %arg6[%c0_15, %c0_16, %c0_17] : memref<2x1x128xf32, #tpu.memory_space<vmem>>, vector<1x1x128xf32>
    %17 = vector.shape_cast %16 : vector<1x1x128xf32> to vector<1x128xf32>
    %c0_18 = arith.constant 0 : index
    %c0_19 = arith.constant 0 : index
    %c0_20 = arith.constant 0 : index
    %18 = vector.load %arg7[%c0_18, %c0_19, %c0_20] : memref<2x128x32xf32, #tpu.memory_space<vmem>>, vector<1x128x32xf32>
    %19 = vector.shape_cast %18 : vector<1x128x32xf32> to vector<128x32xf32>
    %cst = arith.constant dense<0.000000e+00> : vector<16xf32>
    %20 = vector.multi_reduction <add>, %0, %cst [1] : vector<16x32xf32> to vector<16xf32>
    %21 = vector.shape_cast %20 : vector<16xf32> to vector<16x1xf32>
    %cst_21 = arith.constant 3.200000e+01 : f32
    %22 = vector.broadcast %cst_21 : f32 to vector<16x1xf32>
    %23 = arith.divf %21, %22 : vector<16x1xf32>
    %24 = vector.broadcast %23 : vector<16x1xf32> to vector<16x32xf32>
    %25 = arith.subf %0, %24 : vector<16x32xf32>
    %26 = arith.mulf %25, %25 : vector<16x32xf32>
    %cst_22 = arith.constant dense<0.000000e+00> : vector<16xf32>
    %27 = vector.multi_reduction <add>, %26, %cst_22 [1] : vector<16x32xf32> to vector<16xf32>
    %28 = vector.shape_cast %27 : vector<16xf32> to vector<16x1xf32>
    %cst_23 = arith.constant 3.200000e+01 : f32
    %29 = vector.broadcast %cst_23 : f32 to vector<16x1xf32>
    %30 = arith.divf %28, %29 : vector<16x1xf32>
    %31 = vector.broadcast %23 : vector<16x1xf32> to vector<16x32xf32>
    %32 = arith.subf %0, %31 : vector<16x32xf32>
    %cst_24 = arith.constant 9.99999974E-6 : f32
    %33 = vector.broadcast %cst_24 : f32 to vector<16x1xf32>
    %34 = arith.addf %30, %33 : vector<16x1xf32>
    %35 = math.sqrt %34 : vector<16x1xf32>
    %36 = vector.broadcast %35 : vector<16x1xf32> to vector<16x32xf32>
    %37 = arith.divf %32, %36 : vector<16x32xf32>
    %38 = vector.broadcast %4 : vector<1x32xf32> to vector<16x32xf32>
    %39 = arith.mulf %37, %38 : vector<16x32xf32>
    %40 = vector.broadcast %5 : vector<1x32xf32> to vector<16x32xf32>
    %41 = arith.addf %39, %40 : vector<16x32xf32>
    %cst_25 = arith.constant dense<0.000000e+00> : vector<16x96xf32>
    %42 = tpu.matmul %41, %11, %cst_25 {dimension_numbers = #tpu.dot_dimension_numbers<[1], [0], [0], [1], [0, 0, 1, 1], [], []>} : vector<16x32xf32>, vector<32x96xf32>, vector<16x96xf32> -> vector<16x96xf32>
    %43 = vector.extract_strided_slice %42 {offsets = [0, 0], sizes = [16, 32], strides = [1, 1]} : vector<16x96xf32> to vector<16x32xf32>
    %44 = vector.extract_strided_slice %42 {offsets = [0, 32], sizes = [16, 32], strides = [1, 1]} : vector<16x96xf32> to vector<16x32xf32>
    %45 = vector.extract_strided_slice %42 {offsets = [0, 64], sizes = [16, 32], strides = [1, 1]} : vector<16x96xf32> to vector<16x32xf32>
    %46 = vector.extract_strided_slice %43 {offsets = [0, 0], sizes = [16, 8], strides = [1, 1]} : vector<16x32xf32> to vector<16x8xf32>
    %47 = vector.extract_strided_slice %44 {offsets = [0, 0], sizes = [16, 8], strides = [1, 1]} : vector<16x32xf32> to vector<16x8xf32>
    %48 = vector.extract_strided_slice %45 {offsets = [0, 0], sizes = [16, 8], strides = [1, 1]} : vector<16x32xf32> to vector<16x8xf32>
    %49 = tpu.transpose %47, [1, 0] : vector<16x8xf32> -> vector<8x16xf32>
    %cst_26 = arith.constant dense<0.000000e+00> : vector<16x16xf32>
    %50 = tpu.matmul %46, %49, %cst_26 {dimension_numbers = #tpu.dot_dimension_numbers<[1], [0], [0], [1], [0, 0, 1, 1], [], []>} : vector<16x8xf32>, vector<8x16xf32>, vector<16x16xf32> -> vector<16x16xf32>
    %cst_27 = arith.constant 0.353553385 : f32
    %51 = vector.broadcast %cst_27 : f32 to vector<16x16xf32>
    %52 = arith.mulf %50, %51 : vector<16x16xf32>
    %53 = arith.addf %52, %1 : vector<16x16xf32>
    %cst_28 = arith.constant dense<0xFF800000> : vector<16xf32>
    %54 = vector.multi_reduction <maximumf>, %53, %cst_28 [1] : vector<16x16xf32> to vector<16xf32>
    %55 = vector.shape_cast %54 : vector<16xf32> to vector<16x1xf32>
    %56 = vector.broadcast %55 : vector<16x1xf32> to vector<16x16xf32>
    %57 = arith.subf %53, %56 : vector<16x16xf32>
    %58 = math.exp %57 : vector<16x16xf32>
    %cst_29 = arith.constant dense<0.000000e+00> : vector<16xf32>
    %59 = vector.multi_reduction <add>, %58, %cst_29 [1] : vector<16x16xf32> to vector<16xf32>
    %60 = vector.shape_cast %59 : vector<16xf32> to vector<16x1xf32>
    %61 = tpu.reciprocal %60 {approx = true} : vector<16x1xf32> -> vector<16x1xf32>
    %62 = vector.broadcast %61 : vector<16x1xf32> to vector<16x16xf32>
    %63 = arith.mulf %58, %62 : vector<16x16xf32>
    %cst_30 = arith.constant dense<0.000000e+00> : vector<16x8xf32>
    %64 = tpu.matmul %63, %48, %cst_30 {dimension_numbers = #tpu.dot_dimension_numbers<[1], [0], [0], [1], [0, 0, 1, 1], [], []>} : vector<16x16xf32>, vector<16x8xf32>, vector<16x8xf32> -> vector<16x8xf32>
    %65 = vector.extract_strided_slice %43 {offsets = [0, 8], sizes = [16, 8], strides = [1, 1]} : vector<16x32xf32> to vector<16x8xf32>
    %66 = vector.extract_strided_slice %44 {offsets = [0, 8], sizes = [16, 8], strides = [1, 1]} : vector<16x32xf32> to vector<16x8xf32>
    %67 = vector.extract_strided_slice %45 {offsets = [0, 8], sizes = [16, 8], strides = [1, 1]} : vector<16x32xf32> to vector<16x8xf32>
    %68 = tpu.transpose %66, [1, 0] : vector<16x8xf32> -> vector<8x16xf32>
    %cst_31 = arith.constant dense<0.000000e+00> : vector<16x16xf32>
    %69 = tpu.matmul %65, %68, %cst_31 {dimension_numbers = #tpu.dot_dimension_numbers<[1], [0], [0], [1], [0, 0, 1, 1], [], []>} : vector<16x8xf32>, vector<8x16xf32>, vector<16x16xf32> -> vector<16x16xf32>
    %cst_32 = arith.constant 0.353553385 : f32
    %70 = vector.broadcast %cst_32 : f32 to vector<16x16xf32>
    %71 = arith.mulf %69, %70 : vector<16x16xf32>
    %72 = arith.addf %71, %1 : vector<16x16xf32>
    %cst_33 = arith.constant dense<0xFF800000> : vector<16xf32>
    %73 = vector.multi_reduction <maximumf>, %72, %cst_33 [1] : vector<16x16xf32> to vector<16xf32>
    %74 = vector.shape_cast %73 : vector<16xf32> to vector<16x1xf32>
    %75 = vector.broadcast %74 : vector<16x1xf32> to vector<16x16xf32>
    %76 = arith.subf %72, %75 : vector<16x16xf32>
    %77 = math.exp %76 : vector<16x16xf32>
    %cst_34 = arith.constant dense<0.000000e+00> : vector<16xf32>
    %78 = vector.multi_reduction <add>, %77, %cst_34 [1] : vector<16x16xf32> to vector<16xf32>
    %79 = vector.shape_cast %78 : vector<16xf32> to vector<16x1xf32>
    %80 = tpu.reciprocal %79 {approx = true} : vector<16x1xf32> -> vector<16x1xf32>
    %81 = vector.broadcast %80 : vector<16x1xf32> to vector<16x16xf32>
    %82 = arith.mulf %77, %81 : vector<16x16xf32>
    %cst_35 = arith.constant dense<0.000000e+00> : vector<16x8xf32>
    %83 = tpu.matmul %82, %67, %cst_35 {dimension_numbers = #tpu.dot_dimension_numbers<[1], [0], [0], [1], [0, 0, 1, 1], [], []>} : vector<16x16xf32>, vector<16x8xf32>, vector<16x8xf32> -> vector<16x8xf32>
    %84 = vector.extract_strided_slice %43 {offsets = [0, 16], sizes = [16, 8], strides = [1, 1]} : vector<16x32xf32> to vector<16x8xf32>
    %85 = vector.extract_strided_slice %44 {offsets = [0, 16], sizes = [16, 8], strides = [1, 1]} : vector<16x32xf32> to vector<16x8xf32>
    %86 = vector.extract_strided_slice %45 {offsets = [0, 16], sizes = [16, 8], strides = [1, 1]} : vector<16x32xf32> to vector<16x8xf32>
    %87 = tpu.transpose %85, [1, 0] : vector<16x8xf32> -> vector<8x16xf32>
    %cst_36 = arith.constant dense<0.000000e+00> : vector<16x16xf32>
    %88 = tpu.matmul %84, %87, %cst_36 {dimension_numbers = #tpu.dot_dimension_numbers<[1], [0], [0], [1], [0, 0, 1, 1], [], []>} : vector<16x8xf32>, vector<8x16xf32>, vector<16x16xf32> -> vector<16x16xf32>
    %cst_37 = arith.constant 0.353553385 : f32
    %89 = vector.broadcast %cst_37 : f32 to vector<16x16xf32>
    %90 = arith.mulf %88, %89 : vector<16x16xf32>
    %91 = arith.addf %90, %1 : vector<16x16xf32>
    %cst_38 = arith.constant dense<0xFF800000> : vector<16xf32>
    %92 = vector.multi_reduction <maximumf>, %91, %cst_38 [1] : vector<16x16xf32> to vector<16xf32>
    %93 = vector.shape_cast %92 : vector<16xf32> to vector<16x1xf32>
    %94 = vector.broadcast %93 : vector<16x1xf32> to vector<16x16xf32>
    %95 = arith.subf %91, %94 : vector<16x16xf32>
    %96 = math.exp %95 : vector<16x16xf32>
    %cst_39 = arith.constant dense<0.000000e+00> : vector<16xf32>
    %97 = vector.multi_reduction <add>, %96, %cst_39 [1] : vector<16x16xf32> to vector<16xf32>
    %98 = vector.shape_cast %97 : vector<16xf32> to vector<16x1xf32>
    %99 = tpu.reciprocal %98 {approx = true} : vector<16x1xf32> -> vector<16x1xf32>
    %100 = vector.broadcast %99 : vector<16x1xf32> to vector<16x16xf32>
    %101 = arith.mulf %96, %100 : vector<16x16xf32>
    %cst_40 = arith.constant dense<0.000000e+00> : vector<16x8xf32>
    %102 = tpu.matmul %101, %86, %cst_40 {dimension_numbers = #tpu.dot_dimension_numbers<[1], [0], [0], [1], [0, 0, 1, 1], [], []>} : vector<16x16xf32>, vector<16x8xf32>, vector<16x8xf32> -> vector<16x8xf32>
    %103 = vector.extract_strided_slice %43 {offsets = [0, 24], sizes = [16, 8], strides = [1, 1]} : vector<16x32xf32> to vector<16x8xf32>
    %104 = vector.extract_strided_slice %44 {offsets = [0, 24], sizes = [16, 8], strides = [1, 1]} : vector<16x32xf32> to vector<16x8xf32>
    %105 = vector.extract_strided_slice %45 {offsets = [0, 24], sizes = [16, 8], strides = [1, 1]} : vector<16x32xf32> to vector<16x8xf32>
    %106 = tpu.transpose %104, [1, 0] : vector<16x8xf32> -> vector<8x16xf32>
    %cst_41 = arith.constant dense<0.000000e+00> : vector<16x16xf32>
    %107 = tpu.matmul %103, %106, %cst_41 {dimension_numbers = #tpu.dot_dimension_numbers<[1], [0], [0], [1], [0, 0, 1, 1], [], []>} : vector<16x8xf32>, vector<8x16xf32>, vector<16x16xf32> -> vector<16x16xf32>
    %cst_42 = arith.constant 0.353553385 : f32
    %108 = vector.broadcast %cst_42 : f32 to vector<16x16xf32>
    %109 = arith.mulf %107, %108 : vector<16x16xf32>
    %110 = arith.addf %109, %1 : vector<16x16xf32>
    %cst_43 = arith.constant dense<0xFF800000> : vector<16xf32>
    %111 = vector.multi_reduction <maximumf>, %110, %cst_43 [1] : vector<16x16xf32> to vector<16xf32>
    %112 = vector.shape_cast %111 : vector<16xf32> to vector<16x1xf32>
    %113 = vector.broadcast %112 : vector<16x1xf32> to vector<16x16xf32>
    %114 = arith.subf %110, %113 : vector<16x16xf32>
    %115 = math.exp %114 : vector<16x16xf32>
    %cst_44 = arith.constant dense<0.000000e+00> : vector<16xf32>
    %116 = vector.multi_reduction <add>, %115, %cst_44 [1] : vector<16x16xf32> to vector<16xf32>
    %117 = vector.shape_cast %116 : vector<16xf32> to vector<16x1xf32>
    %118 = tpu.reciprocal %117 {approx = true} : vector<16x1xf32> -> vector<16x1xf32>
    %119 = vector.broadcast %118 : vector<16x1xf32> to vector<16x16xf32>
    %120 = arith.mulf %115, %119 : vector<16x16xf32>
    %cst_45 = arith.constant dense<0.000000e+00> : vector<16x8xf32>
    %121 = tpu.matmul %120, %105, %cst_45 {dimension_numbers = #tpu.dot_dimension_numbers<[1], [0], [0], [1], [0, 0, 1, 1], [], []>} : vector<16x16xf32>, vector<16x8xf32>, vector<16x8xf32> -> vector<16x8xf32>
    %122 = tpu.concatenate %64, %83, %102, %121 in 1 : vector<16x8xf32>, vector<16x8xf32>, vector<16x8xf32>, vector<16x8xf32> -> vector<16x32xf32>
    %cst_46 = arith.constant dense<0.000000e+00> : vector<16x32xf32>
    %123 = tpu.matmul %122, %13, %cst_46 {dimension_numbers = #tpu.dot_dimension_numbers<[1], [0], [0], [1], [0, 0, 1, 1], [], []>} : vector<16x32xf32>, vector<32x32xf32>, vector<16x32xf32> -> vector<16x32xf32>
    %124 = arith.addf %0, %123 : vector<16x32xf32>
    %125 = vector.broadcast %8 : vector<1x32xf32> to vector<16x32xf32>
    %126 = arith.addf %124, %125 : vector<16x32xf32>
    %cst_47 = arith.constant dense<0.000000e+00> : vector<16xf32>
    %127 = vector.multi_reduction <add>, %126, %cst_47 [1] : vector<16x32xf32> to vector<16xf32>
    %128 = vector.shape_cast %127 : vector<16xf32> to vector<16x1xf32>
    %cst_48 = arith.constant 3.200000e+01 : f32
    %129 = vector.broadcast %cst_48 : f32 to vector<16x1xf32>
    %130 = arith.divf %128, %129 : vector<16x1xf32>
    %131 = vector.broadcast %130 : vector<16x1xf32> to vector<16x32xf32>
    %132 = arith.subf %126, %131 : vector<16x32xf32>
    %133 = arith.mulf %132, %132 : vector<16x32xf32>
    %cst_49 = arith.constant dense<0.000000e+00> : vector<16xf32>
    %134 = vector.multi_reduction <add>, %133, %cst_49 [1] : vector<16x32xf32> to vector<16xf32>
    %135 = vector.shape_cast %134 : vector<16xf32> to vector<16x1xf32>
    %cst_50 = arith.constant 3.200000e+01 : f32
    %136 = vector.broadcast %cst_50 : f32 to vector<16x1xf32>
    %137 = arith.divf %135, %136 : vector<16x1xf32>
    %138 = vector.broadcast %130 : vector<16x1xf32> to vector<16x32xf32>
    %139 = arith.subf %126, %138 : vector<16x32xf32>
    %cst_51 = arith.constant 9.99999974E-6 : f32
    %140 = vector.broadcast %cst_51 : f32 to vector<16x1xf32>
    %141 = arith.addf %137, %140 : vector<16x1xf32>
    %142 = math.sqrt %141 : vector<16x1xf32>
    %143 = vector.broadcast %142 : vector<16x1xf32> to vector<16x32xf32>
    %144 = arith.divf %139, %143 : vector<16x32xf32>
    %145 = vector.broadcast %6 : vector<1x32xf32> to vector<16x32xf32>
    %146 = arith.mulf %144, %145 : vector<16x32xf32>
    %147 = vector.broadcast %7 : vector<1x32xf32> to vector<16x32xf32>
    %148 = arith.addf %146, %147 : vector<16x32xf32>
    %cst_52 = arith.constant dense<0.000000e+00> : vector<16x128xf32>
    %149 = tpu.matmul %148, %15, %cst_52 {dimension_numbers = #tpu.dot_dimension_numbers<[1], [0], [0], [1], [0, 0, 1, 1], [], []>} : vector<16x32xf32>, vector<32x128xf32>, vector<16x128xf32> -> vector<16x128xf32>
    %150 = vector.broadcast %17 : vector<1x128xf32> to vector<16x128xf32>
    %151 = arith.addf %149, %150 : vector<16x128xf32>
    %cst_53 = arith.constant 5.000000e-01 : f32
    %152 = vector.broadcast %cst_53 : f32 to vector<16x128xf32>
    %153 = arith.mulf %151, %152 : vector<16x128xf32>
    %154 = arith.mulf %151, %151 : vector<16x128xf32>
    %155 = arith.mulf %151, %154 : vector<16x128xf32>
    %cst_54 = arith.constant 4.471500e-02 : f32
    %156 = vector.broadcast %cst_54 : f32 to vector<16x128xf32>
    %157 = arith.mulf %156, %155 : vector<16x128xf32>
    %158 = arith.addf %151, %157 : vector<16x128xf32>
    %cst_55 = arith.constant 0.797884583 : f32
    %159 = vector.broadcast %cst_55 : f32 to vector<16x128xf32>
    %160 = arith.mulf %159, %158 : vector<16x128xf32>
    %161 = math.tanh %160 : vector<16x128xf32>
    %cst_56 = arith.constant 1.000000e+00 : f32
    %162 = vector.broadcast %cst_56 : f32 to vector<16x128xf32>
    %163 = arith.addf %162, %161 : vector<16x128xf32>
    %164 = arith.mulf %153, %163 : vector<16x128xf32>
    %cst_57 = arith.constant dense<0.000000e+00> : vector<16x32xf32>
    %165 = tpu.matmul %164, %19, %cst_57 {dimension_numbers = #tpu.dot_dimension_numbers<[1], [0], [0], [1], [0, 0, 1, 1], [], []>} : vector<16x128xf32>, vector<128x32xf32>, vector<16x32xf32> -> vector<16x32xf32>
    %166 = arith.addf %126, %165 : vector<16x32xf32>
    %167 = vector.broadcast %9 : vector<1x32xf32> to vector<16x32xf32>
    %168 = arith.addf %166, %167 : vector<16x32xf32>
    %c1 = arith.constant 1 : index
    %c0_58 = arith.constant 0 : index
    %c0_59 = arith.constant 0 : index
    %169 = vector.load %arg2[%c1, %c0_58, %c0_59] : memref<2x6x32xf32, #tpu.memory_space<vmem>>, vector<1x6x32xf32>
    %170 = vector.shape_cast %169 : vector<1x6x32xf32> to vector<6x32xf32>
    %171 = vector.extract_strided_slice %170 {offsets = [0, 0], sizes = [1, 32], strides = [1, 1]} : vector<6x32xf32> to vector<1x32xf32>
    %172 = vector.extract_strided_slice %170 {offsets = [1, 0], sizes = [1, 32], strides = [1, 1]} : vector<6x32xf32> to vector<1x32xf32>
    %173 = vector.extract_strided_slice %170 {offsets = [2, 0], sizes = [1, 32], strides = [1, 1]} : vector<6x32xf32> to vector<1x32xf32>
    %174 = vector.extract_strided_slice %170 {offsets = [3, 0], sizes = [1, 32], strides = [1, 1]} : vector<6x32xf32> to vector<1x32xf32>
    %175 = vector.extract_strided_slice %170 {offsets = [4, 0], sizes = [1, 32], strides = [1, 1]} : vector<6x32xf32> to vector<1x32xf32>
    %176 = vector.extract_strided_slice %170 {offsets = [5, 0], sizes = [1, 32], strides = [1, 1]} : vector<6x32xf32> to vector<1x32xf32>
    %c1_60 = arith.constant 1 : index
    %c0_61 = arith.constant 0 : index
    %c0_62 = arith.constant 0 : index
    %177 = vector.load %arg3[%c1_60, %c0_61, %c0_62] : memref<2x32x96xf32, #tpu.memory_space<vmem>>, vector<1x32x96xf32>
    %178 = vector.shape_cast %177 : vector<1x32x96xf32> to vector<32x96xf32>
    %c1_63 = arith.constant 1 : index
    %c0_64 = arith.constant 0 : index
    %c0_65 = arith.constant 0 : index
    %179 = vector.load %arg4[%c1_63, %c0_64, %c0_65] : memref<2x32x32xf32, #tpu.memory_space<vmem>>, vector<1x32x32xf32>
    %180 = vector.shape_cast %179 : vector<1x32x32xf32> to vector<32x32xf32>
    %c1_66 = arith.constant 1 : index
    %c0_67 = arith.constant 0 : index
    %c0_68 = arith.constant 0 : index
    %181 = vector.load %arg5[%c1_66, %c0_67, %c0_68] : memref<2x32x128xf32, #tpu.memory_space<vmem>>, vector<1x32x128xf32>
    %182 = vector.shape_cast %181 : vector<1x32x128xf32> to vector<32x128xf32>
    %c1_69 = arith.constant 1 : index
    %c0_70 = arith.constant 0 : index
    %c0_71 = arith.constant 0 : index
    %183 = vector.load %arg6[%c1_69, %c0_70, %c0_71] : memref<2x1x128xf32, #tpu.memory_space<vmem>>, vector<1x1x128xf32>
    %184 = vector.shape_cast %183 : vector<1x1x128xf32> to vector<1x128xf32>
    %c1_72 = arith.constant 1 : index
    %c0_73 = arith.constant 0 : index
    %c0_74 = arith.constant 0 : index
    %185 = vector.load %arg7[%c1_72, %c0_73, %c0_74] : memref<2x128x32xf32, #tpu.memory_space<vmem>>, vector<1x128x32xf32>
    %186 = vector.shape_cast %185 : vector<1x128x32xf32> to vector<128x32xf32>
    %cst_75 = arith.constant dense<0.000000e+00> : vector<16xf32>
    %187 = vector.multi_reduction <add>, %168, %cst_75 [1] : vector<16x32xf32> to vector<16xf32>
    %188 = vector.shape_cast %187 : vector<16xf32> to vector<16x1xf32>
    %cst_76 = arith.constant 3.200000e+01 : f32
    %189 = vector.broadcast %cst_76 : f32 to vector<16x1xf32>
    %190 = arith.divf %188, %189 : vector<16x1xf32>
    %191 = vector.broadcast %190 : vector<16x1xf32> to vector<16x32xf32>
    %192 = arith.subf %168, %191 : vector<16x32xf32>
    %193 = arith.mulf %192, %192 : vector<16x32xf32>
    %cst_77 = arith.constant dense<0.000000e+00> : vector<16xf32>
    %194 = vector.multi_reduction <add>, %193, %cst_77 [1] : vector<16x32xf32> to vector<16xf32>
    %195 = vector.shape_cast %194 : vector<16xf32> to vector<16x1xf32>
    %cst_78 = arith.constant 3.200000e+01 : f32
    %196 = vector.broadcast %cst_78 : f32 to vector<16x1xf32>
    %197 = arith.divf %195, %196 : vector<16x1xf32>
    %198 = vector.broadcast %190 : vector<16x1xf32> to vector<16x32xf32>
    %199 = arith.subf %168, %198 : vector<16x32xf32>
    %cst_79 = arith.constant 9.99999974E-6 : f32
    %200 = vector.broadcast %cst_79 : f32 to vector<16x1xf32>
    %201 = arith.addf %197, %200 : vector<16x1xf32>
    %202 = math.sqrt %201 : vector<16x1xf32>
    %203 = vector.broadcast %202 : vector<16x1xf32> to vector<16x32xf32>
    %204 = arith.divf %199, %203 : vector<16x32xf32>
    %205 = vector.broadcast %171 : vector<1x32xf32> to vector<16x32xf32>
    %206 = arith.mulf %204, %205 : vector<16x32xf32>
    %207 = vector.broadcast %172 : vector<1x32xf32> to vector<16x32xf32>
    %208 = arith.addf %206, %207 : vector<16x32xf32>
    %cst_80 = arith.constant dense<0.000000e+00> : vector<16x96xf32>
    %209 = tpu.matmul %208, %178, %cst_80 {dimension_numbers = #tpu.dot_dimension_numbers<[1], [0], [0], [1], [0, 0, 1, 1], [], []>} : vector<16x32xf32>, vector<32x96xf32>, vector<16x96xf32> -> vector<16x96xf32>
    %210 = vector.extract_strided_slice %209 {offsets = [0, 0], sizes = [16, 32], strides = [1, 1]} : vector<16x96xf32> to vector<16x32xf32>
    %211 = vector.extract_strided_slice %209 {offsets = [0, 32], sizes = [16, 32], strides = [1, 1]} : vector<16x96xf32> to vector<16x32xf32>
    %212 = vector.extract_strided_slice %209 {offsets = [0, 64], sizes = [16, 32], strides = [1, 1]} : vector<16x96xf32> to vector<16x32xf32>
    %213 = vector.extract_strided_slice %210 {offsets = [0, 0], sizes = [16, 8], strides = [1, 1]} : vector<16x32xf32> to vector<16x8xf32>
    %214 = vector.extract_strided_slice %211 {offsets = [0, 0], sizes = [16, 8], strides = [1, 1]} : vector<16x32xf32> to vector<16x8xf32>
    %215 = vector.extract_strided_slice %212 {offsets = [0, 0], sizes = [16, 8], strides = [1, 1]} : vector<16x32xf32> to vector<16x8xf32>
    %216 = tpu.transpose %214, [1, 0] : vector<16x8xf32> -> vector<8x16xf32>
    %cst_81 = arith.constant dense<0.000000e+00> : vector<16x16xf32>
    %217 = tpu.matmul %213, %216, %cst_81 {dimension_numbers = #tpu.dot_dimension_numbers<[1], [0], [0], [1], [0, 0, 1, 1], [], []>} : vector<16x8xf32>, vector<8x16xf32>, vector<16x16xf32> -> vector<16x16xf32>
    %cst_82 = arith.constant 0.353553385 : f32
    %218 = vector.broadcast %cst_82 : f32 to vector<16x16xf32>
    %219 = arith.mulf %217, %218 : vector<16x16xf32>
    %220 = arith.addf %219, %1 : vector<16x16xf32>
    %cst_83 = arith.constant dense<0xFF800000> : vector<16xf32>
    %221 = vector.multi_reduction <maximumf>, %220, %cst_83 [1] : vector<16x16xf32> to vector<16xf32>
    %222 = vector.shape_cast %221 : vector<16xf32> to vector<16x1xf32>
    %223 = vector.broadcast %222 : vector<16x1xf32> to vector<16x16xf32>
    %224 = arith.subf %220, %223 : vector<16x16xf32>
    %225 = math.exp %224 : vector<16x16xf32>
    %cst_84 = arith.constant dense<0.000000e+00> : vector<16xf32>
    %226 = vector.multi_reduction <add>, %225, %cst_84 [1] : vector<16x16xf32> to vector<16xf32>
    %227 = vector.shape_cast %226 : vector<16xf32> to vector<16x1xf32>
    %228 = tpu.reciprocal %227 {approx = true} : vector<16x1xf32> -> vector<16x1xf32>
    %229 = vector.broadcast %228 : vector<16x1xf32> to vector<16x16xf32>
    %230 = arith.mulf %225, %229 : vector<16x16xf32>
    %cst_85 = arith.constant dense<0.000000e+00> : vector<16x8xf32>
    %231 = tpu.matmul %230, %215, %cst_85 {dimension_numbers = #tpu.dot_dimension_numbers<[1], [0], [0], [1], [0, 0, 1, 1], [], []>} : vector<16x16xf32>, vector<16x8xf32>, vector<16x8xf32> -> vector<16x8xf32>
    %232 = vector.extract_strided_slice %210 {offsets = [0, 8], sizes = [16, 8], strides = [1, 1]} : vector<16x32xf32> to vector<16x8xf32>
    %233 = vector.extract_strided_slice %211 {offsets = [0, 8], sizes = [16, 8], strides = [1, 1]} : vector<16x32xf32> to vector<16x8xf32>
    %234 = vector.extract_strided_slice %212 {offsets = [0, 8], sizes = [16, 8], strides = [1, 1]} : vector<16x32xf32> to vector<16x8xf32>
    %235 = tpu.transpose %233, [1, 0] : vector<16x8xf32> -> vector<8x16xf32>
    %cst_86 = arith.constant dense<0.000000e+00> : vector<16x16xf32>
    %236 = tpu.matmul %232, %235, %cst_86 {dimension_numbers = #tpu.dot_dimension_numbers<[1], [0], [0], [1], [0, 0, 1, 1], [], []>} : vector<16x8xf32>, vector<8x16xf32>, vector<16x16xf32> -> vector<16x16xf32>
    %cst_87 = arith.constant 0.353553385 : f32
    %237 = vector.broadcast %cst_87 : f32 to vector<16x16xf32>
    %238 = arith.mulf %236, %237 : vector<16x16xf32>
    %239 = arith.addf %238, %1 : vector<16x16xf32>
    %cst_88 = arith.constant dense<0xFF800000> : vector<16xf32>
    %240 = vector.multi_reduction <maximumf>, %239, %cst_88 [1] : vector<16x16xf32> to vector<16xf32>
    %241 = vector.shape_cast %240 : vector<16xf32> to vector<16x1xf32>
    %242 = vector.broadcast %241 : vector<16x1xf32> to vector<16x16xf32>
    %243 = arith.subf %239, %242 : vector<16x16xf32>
    %244 = math.exp %243 : vector<16x16xf32>
    %cst_89 = arith.constant dense<0.000000e+00> : vector<16xf32>
    %245 = vector.multi_reduction <add>, %244, %cst_89 [1] : vector<16x16xf32> to vector<16xf32>
    %246 = vector.shape_cast %245 : vector<16xf32> to vector<16x1xf32>
    %247 = tpu.reciprocal %246 {approx = true} : vector<16x1xf32> -> vector<16x1xf32>
    %248 = vector.broadcast %247 : vector<16x1xf32> to vector<16x16xf32>
    %249 = arith.mulf %244, %248 : vector<16x16xf32>
    %cst_90 = arith.constant dense<0.000000e+00> : vector<16x8xf32>
    %250 = tpu.matmul %249, %234, %cst_90 {dimension_numbers = #tpu.dot_dimension_numbers<[1], [0], [0], [1], [0, 0, 1, 1], [], []>} : vector<16x16xf32>, vector<16x8xf32>, vector<16x8xf32> -> vector<16x8xf32>
    %251 = vector.extract_strided_slice %210 {offsets = [0, 16], sizes = [16, 8], strides = [1, 1]} : vector<16x32xf32> to vector<16x8xf32>
    %252 = vector.extract_strided_slice %211 {offsets = [0, 16], sizes = [16, 8], strides = [1, 1]} : vector<16x32xf32> to vector<16x8xf32>
    %253 = vector.extract_strided_slice %212 {offsets = [0, 16], sizes = [16, 8], strides = [1, 1]} : vector<16x32xf32> to vector<16x8xf32>
    %254 = tpu.transpose %252, [1, 0] : vector<16x8xf32> -> vector<8x16xf32>
    %cst_91 = arith.constant dense<0.000000e+00> : vector<16x16xf32>
    %255 = tpu.matmul %251, %254, %cst_91 {dimension_numbers = #tpu.dot_dimension_numbers<[1], [0], [0], [1], [0, 0, 1, 1], [], []>} : vector<16x8xf32>, vector<8x16xf32>, vector<16x16xf32> -> vector<16x16xf32>
    %cst_92 = arith.constant 0.353553385 : f32
    %256 = vector.broadcast %cst_92 : f32 to vector<16x16xf32>
    %257 = arith.mulf %255, %256 : vector<16x16xf32>
    %258 = arith.addf %257, %1 : vector<16x16xf32>
    %cst_93 = arith.constant dense<0xFF800000> : vector<16xf32>
    %259 = vector.multi_reduction <maximumf>, %258, %cst_93 [1] : vector<16x16xf32> to vector<16xf32>
    %260 = vector.shape_cast %259 : vector<16xf32> to vector<16x1xf32>
    %261 = vector.broadcast %260 : vector<16x1xf32> to vector<16x16xf32>
    %262 = arith.subf %258, %261 : vector<16x16xf32>
    %263 = math.exp %262 : vector<16x16xf32>
    %cst_94 = arith.constant dense<0.000000e+00> : vector<16xf32>
    %264 = vector.multi_reduction <add>, %263, %cst_94 [1] : vector<16x16xf32> to vector<16xf32>
    %265 = vector.shape_cast %264 : vector<16xf32> to vector<16x1xf32>
    %266 = tpu.reciprocal %265 {approx = true} : vector<16x1xf32> -> vector<16x1xf32>
    %267 = vector.broadcast %266 : vector<16x1xf32> to vector<16x16xf32>
    %268 = arith.mulf %263, %267 : vector<16x16xf32>
    %cst_95 = arith.constant dense<0.000000e+00> : vector<16x8xf32>
    %269 = tpu.matmul %268, %253, %cst_95 {dimension_numbers = #tpu.dot_dimension_numbers<[1], [0], [0], [1], [0, 0, 1, 1], [], []>} : vector<16x16xf32>, vector<16x8xf32>, vector<16x8xf32> -> vector<16x8xf32>
    %270 = vector.extract_strided_slice %210 {offsets = [0, 24], sizes = [16, 8], strides = [1, 1]} : vector<16x32xf32> to vector<16x8xf32>
    %271 = vector.extract_strided_slice %211 {offsets = [0, 24], sizes = [16, 8], strides = [1, 1]} : vector<16x32xf32> to vector<16x8xf32>
    %272 = vector.extract_strided_slice %212 {offsets = [0, 24], sizes = [16, 8], strides = [1, 1]} : vector<16x32xf32> to vector<16x8xf32>
    %273 = tpu.transpose %271, [1, 0] : vector<16x8xf32> -> vector<8x16xf32>
    %cst_96 = arith.constant dense<0.000000e+00> : vector<16x16xf32>
    %274 = tpu.matmul %270, %273, %cst_96 {dimension_numbers = #tpu.dot_dimension_numbers<[1], [0], [0], [1], [0, 0, 1, 1], [], []>} : vector<16x8xf32>, vector<8x16xf32>, vector<16x16xf32> -> vector<16x16xf32>
    %cst_97 = arith.constant 0.353553385 : f32
    %275 = vector.broadcast %cst_97 : f32 to vector<16x16xf32>
    %276 = arith.mulf %274, %275 : vector<16x16xf32>
    %277 = arith.addf %276, %1 : vector<16x16xf32>
    %cst_98 = arith.constant dense<0xFF800000> : vector<16xf32>
    %278 = vector.multi_reduction <maximumf>, %277, %cst_98 [1] : vector<16x16xf32> to vector<16xf32>
    %279 = vector.shape_cast %278 : vector<16xf32> to vector<16x1xf32>
    %280 = vector.broadcast %279 : vector<16x1xf32> to vector<16x16xf32>
    %281 = arith.subf %277, %280 : vector<16x16xf32>
    %282 = math.exp %281 : vector<16x16xf32>
    %cst_99 = arith.constant dense<0.000000e+00> : vector<16xf32>
    %283 = vector.multi_reduction <add>, %282, %cst_99 [1] : vector<16x16xf32> to vector<16xf32>
    %284 = vector.shape_cast %283 : vector<16xf32> to vector<16x1xf32>
    %285 = tpu.reciprocal %284 {approx = true} : vector<16x1xf32> -> vector<16x1xf32>
    %286 = vector.broadcast %285 : vector<16x1xf32> to vector<16x16xf32>
    %287 = arith.mulf %282, %286 : vector<16x16xf32>
    %cst_100 = arith.constant dense<0.000000e+00> : vector<16x8xf32>
    %288 = tpu.matmul %287, %272, %cst_100 {dimension_numbers = #tpu.dot_dimension_numbers<[1], [0], [0], [1], [0, 0, 1, 1], [], []>} : vector<16x16xf32>, vector<16x8xf32>, vector<16x8xf32> -> vector<16x8xf32>
    %289 = tpu.concatenate %231, %250, %269, %288 in 1 : vector<16x8xf32>, vector<16x8xf32>, vector<16x8xf32>, vector<16x8xf32> -> vector<16x32xf32>
    %cst_101 = arith.constant dense<0.000000e+00> : vector<16x32xf32>
    %290 = tpu.matmul %289, %180, %cst_101 {dimension_numbers = #tpu.dot_dimension_numbers<[1], [0], [0], [1], [0, 0, 1, 1], [], []>} : vector<16x32xf32>, vector<32x32xf32>, vector<16x32xf32> -> vector<16x32xf32>
    %291 = arith.addf %168, %290 : vector<16x32xf32>
    %292 = vector.broadcast %175 : vector<1x32xf32> to vector<16x32xf32>
    %293 = arith.addf %291, %292 : vector<16x32xf32>
    %cst_102 = arith.constant dense<0.000000e+00> : vector<16xf32>
    %294 = vector.multi_reduction <add>, %293, %cst_102 [1] : vector<16x32xf32> to vector<16xf32>
    %295 = vector.shape_cast %294 : vector<16xf32> to vector<16x1xf32>
    %cst_103 = arith.constant 3.200000e+01 : f32
    %296 = vector.broadcast %cst_103 : f32 to vector<16x1xf32>
    %297 = arith.divf %295, %296 : vector<16x1xf32>
    %298 = vector.broadcast %297 : vector<16x1xf32> to vector<16x32xf32>
    %299 = arith.subf %293, %298 : vector<16x32xf32>
    %300 = arith.mulf %299, %299 : vector<16x32xf32>
    %cst_104 = arith.constant dense<0.000000e+00> : vector<16xf32>
    %301 = vector.multi_reduction <add>, %300, %cst_104 [1] : vector<16x32xf32> to vector<16xf32>
    %302 = vector.shape_cast %301 : vector<16xf32> to vector<16x1xf32>
    %cst_105 = arith.constant 3.200000e+01 : f32
    %303 = vector.broadcast %cst_105 : f32 to vector<16x1xf32>
    %304 = arith.divf %302, %303 : vector<16x1xf32>
    %305 = vector.broadcast %297 : vector<16x1xf32> to vector<16x32xf32>
    %306 = arith.subf %293, %305 : vector<16x32xf32>
    %cst_106 = arith.constant 9.99999974E-6 : f32
    %307 = vector.broadcast %cst_106 : f32 to vector<16x1xf32>
    %308 = arith.addf %304, %307 : vector<16x1xf32>
    %309 = math.sqrt %308 : vector<16x1xf32>
    %310 = vector.broadcast %309 : vector<16x1xf32> to vector<16x32xf32>
    %311 = arith.divf %306, %310 : vector<16x32xf32>
    %312 = vector.broadcast %173 : vector<1x32xf32> to vector<16x32xf32>
    %313 = arith.mulf %311, %312 : vector<16x32xf32>
    %314 = vector.broadcast %174 : vector<1x32xf32> to vector<16x32xf32>
    %315 = arith.addf %313, %314 : vector<16x32xf32>
    %cst_107 = arith.constant dense<0.000000e+00> : vector<16x128xf32>
    %316 = tpu.matmul %315, %182, %cst_107 {dimension_numbers = #tpu.dot_dimension_numbers<[1], [0], [0], [1], [0, 0, 1, 1], [], []>} : vector<16x32xf32>, vector<32x128xf32>, vector<16x128xf32> -> vector<16x128xf32>
    %317 = vector.broadcast %184 : vector<1x128xf32> to vector<16x128xf32>
    %318 = arith.addf %316, %317 : vector<16x128xf32>
    %cst_108 = arith.constant 5.000000e-01 : f32
    %319 = vector.broadcast %cst_108 : f32 to vector<16x128xf32>
    %320 = arith.mulf %318, %319 : vector<16x128xf32>
    %321 = arith.mulf %318, %318 : vector<16x128xf32>
    %322 = arith.mulf %318, %321 : vector<16x128xf32>
    %cst_109 = arith.constant 4.471500e-02 : f32
    %323 = vector.broadcast %cst_109 : f32 to vector<16x128xf32>
    %324 = arith.mulf %323, %322 : vector<16x128xf32>
    %325 = arith.addf %318, %324 : vector<16x128xf32>
    %cst_110 = arith.constant 0.797884583 : f32
    %326 = vector.broadcast %cst_110 : f32 to vector<16x128xf32>
    %327 = arith.mulf %326, %325 : vector<16x128xf32>
    %328 = math.tanh %327 : vector<16x128xf32>
    %cst_111 = arith.constant 1.000000e+00 : f32
    %329 = vector.broadcast %cst_111 : f32 to vector<16x128xf32>
    %330 = arith.addf %329, %328 : vector<16x128xf32>
    %331 = arith.mulf %320, %330 : vector<16x128xf32>
    %cst_112 = arith.constant dense<0.000000e+00> : vector<16x32xf32>
    %332 = tpu.matmul %331, %186, %cst_112 {dimension_numbers = #tpu.dot_dimension_numbers<[1], [0], [0], [1], [0, 0, 1, 1], [], []>} : vector<16x128xf32>, vector<128x32xf32>, vector<16x32xf32> -> vector<16x32xf32>
    %333 = arith.addf %293, %332 : vector<16x32xf32>
    %334 = vector.broadcast %176 : vector<1x32xf32> to vector<16x32xf32>
    %335 = arith.addf %333, %334 : vector<16x32xf32>
    %c0_113 = arith.constant 0 : index
    %c0_114 = arith.constant 0 : index
    %336 = vector.load %arg8[%c0_113, %c0_114] : memref<2x32xf32, #tpu.memory_space<vmem>>, vector<2x32xf32>
    %337 = vector.extract_strided_slice %336 {offsets = [0, 0], sizes = [1, 32], strides = [1, 1]} : vector<2x32xf32> to vector<1x32xf32>
    %338 = vector.extract_strided_slice %336 {offsets = [1, 0], sizes = [1, 32], strides = [1, 1]} : vector<2x32xf32> to vector<1x32xf32>
    %cst_115 = arith.constant dense<0.000000e+00> : vector<16xf32>
    %339 = vector.multi_reduction <add>, %335, %cst_115 [1] : vector<16x32xf32> to vector<16xf32>
    %340 = vector.shape_cast %339 : vector<16xf32> to vector<16x1xf32>
    %cst_116 = arith.constant 3.200000e+01 : f32
    %341 = vector.broadcast %cst_116 : f32 to vector<16x1xf32>
    %342 = arith.divf %340, %341 : vector<16x1xf32>
    %343 = vector.broadcast %342 : vector<16x1xf32> to vector<16x32xf32>
    %344 = arith.subf %335, %343 : vector<16x32xf32>
    %345 = arith.mulf %344, %344 : vector<16x32xf32>
    %cst_117 = arith.constant dense<0.000000e+00> : vector<16xf32>
    %346 = vector.multi_reduction <add>, %345, %cst_117 [1] : vector<16x32xf32> to vector<16xf32>
    %347 = vector.shape_cast %346 : vector<16xf32> to vector<16x1xf32>
    %cst_118 = arith.constant 3.200000e+01 : f32
    %348 = vector.broadcast %cst_118 : f32 to vector<16x1xf32>
    %349 = arith.divf %347, %348 : vector<16x1xf32>
    %350 = vector.broadcast %342 : vector<16x1xf32> to vector<16x32xf32>
    %351 = arith.subf %335, %350 : vector<16x32xf32>
    %cst_119 = arith.constant 9.99999974E-6 : f32
    %352 = vector.broadcast %cst_119 : f32 to vector<16x1xf32>
    %353 = arith.addf %349, %352 : vector<16x1xf32>
    %354 = math.sqrt %353 : vector<16x1xf32>
    %355 = vector.broadcast %354 : vector<16x1xf32> to vector<16x32xf32>
    %356 = arith.divf %351, %355 : vector<16x32xf32>
    %357 = vector.broadcast %337 : vector<1x32xf32> to vector<16x32xf32>
    %358 = arith.mulf %356, %357 : vector<16x32xf32>
    %359 = vector.broadcast %338 : vector<1x32xf32> to vector<16x32xf32>
    %360 = arith.addf %358, %359 : vector<16x32xf32>
    %c0_120 = arith.constant 0 : index
    %c0_121 = arith.constant 0 : index
    %361 = vector.load %arg9[%c0_120, %c0_121] : memref<32x128xf32, #tpu.memory_space<vmem>>, vector<32x128xf32>
    %cst_122 = arith.constant dense<0.000000e+00> : vector<16x128xf32>
    %362 = tpu.matmul %360, %361, %cst_122 {dimension_numbers = #tpu.dot_dimension_numbers<[1], [0], [0], [1], [0, 0, 1, 1], [], []>} : vector<16x32xf32>, vector<32x128xf32>, vector<16x128xf32> -> vector<16x128xf32>
    %c0_123 = arith.constant 0 : index
    %c0_124 = arith.constant 0 : index
    %363 = vector.load %arg10[%c0_123, %c0_124] : memref<16x128xf32, #tpu.memory_space<vmem>>, vector<16x128xf32>
    tpu.vector_store %arg10[%c0_123, %c0_124], %362 {strides = array<i32>} : memref<16x128xf32, #tpu.memory_space<vmem>>, vector<16x128xf32>,
    return
  }
}

</mosaic_0001>

<bundles_post_ra>
// kernel: _lambda_.1
= control target key start
LH: loop header
LB: loop body
LE: loop exit
PB: predicated region body
PF: predicated region fallthrough
CT: control target
= control target key end

     0   :  { %vm70_vm0 = vcmask 261120   ;;  %s2686_s0 = inlined_call_operand.vmem [shape: f32[16,32], index: 0, kind: input, shape index: {}]   ;;  %s2687_s1 = inlined_call_operand.vmem [shape: f32[16,16], index: 1, kind: input, shape index: {}]   ;;  %s2688_s2 = inlined_call_operand.vmem [shape: f32[2,6,32], index: 2, kind: input, shape index: {}]   ;;  %s2689_s3 = inlined_call_operand.vmem [shape: f32[2,32,96], index: 3, kind: input, shape index: {}]   ;;  %s2690_s4 = inlined_call_operand.vmem [shape: f32[2,32,32], index: 4, kind: input, shape index: {}]   ;;  %s2691_s5 = inlined_call_operand.vmem [shape: f32[2,32,128], index: 5, kind: input, shape index: {}]   ;;  %s2692_s6 = inlined_call_operand.vmem [shape: f32[2,1,128], index: 6, kind: input, shape index: {}]   ;;  %s2693_s7 = inlined_call_operand.vmem [shape: f32[2,128,32], index: 7, kind: input, shape index: {}]   ;;  %s2694_s8 = inlined_call_operand.vmem [shape: f32[2,32], index: 8, kind: input, shape index: {}]   ;;  %s2695_s9 = inlined_call_operand.vmem [shape: f32[32,128], index: 9, kind: input, shape index: {}]   ;;  %s2696_s10 = inlined_call_operand.hbm [shape: f32[16,128], index: 10, kind: output, shape index: {}]  }
   0x1   :  { %v2091_v0 = vld [vmem:[%s2686_s0 + $0x8] sm:$0xff] }
   0x2   :  { %v74_v1 = vsel %vm70_vm0, %v2091_v0, 0.0 }
   0x3   :  { %15 = vsyncpa [#allocation3], 0  ;;  %75 = vadd.xlane.f32.xlu0 %v74_v1  ;;  %v2098_v2 = vld [vmem:[%s2686_s0] sm:$0xff]  ;;  %v2016_v4 = vmov 32.0   ;;  %v44_v21 = vld [vmem:[%s2689_s3 + $0x18] sm:$0xff]  ;;  %s2017_s26 = smov 96  }
   0x4   :  { %v71_v3 = vsel %vm70_vm0, %v2098_v2, 0.0  ;;  %1874 = vrcp.f32 %v2016_v4  ;;  %v43_v22 = vld [vmem:[%s2689_s3 + $0x10] sm:$0xff]  ;;  %1811 = vmatpush.msra.mxu3 %v44_v21  ;;  %178 = vmatpush.msra.mxu0 %v44_v21  ;;  %v42_v23 = vld [vmem:[%s2689_s3 + $0x8] sm:$0xff]  ;;  %v41_v24 = vld [vmem:[%s2689_s3] sm:$0xff]  ;;  %s2018_s27 = smov 120   ;;  %s2019_s28 = smov 88  }
   0x5   :  { %v2135_v57 = vld [vmem:[%s2688_s2] sm:$0x3f]  ;;  %s2020_s29 = smov 80   ;;  %s2021_s30 = smov 72   ;;  %vm195_vm14 = vcmask 64512   ;;  %vm231_vm15 = vcmask 130048  }
   0x6   :  { %1812 = vmatpush.msra.mxu3 %v43_v22  ;;  %179 = vmatpush.msra.mxu0 %v43_v22  ;;  %v154_v62 = vperm.slane %v2135_v57, 0  ;;  %v157_v4 = vperm.slane %v2135_v57, 1  ;;  %s2022_s11 = smov 112   ;;  %s2023_s12 = smov 104  }
   0x7   :  { %s2024_s0 = smov 40   ;;  %s2025_s17 = smov 56  }
   0x8   :  { %1813 = vmatpush.msra.mxu3 %v42_v23  ;;  %180 = vmatpush.msra.mxu0 %v42_v23  ;;  %s2026_s18 = smov 64   ;;  %s2027_s19 = smov 48  }
   0x9   :  { %s2701_s20 = smov 8   ;;  %s2697_s21 = smov 24  }
   0xa   :  { %v1875_v5 = vpop.eup %1874  ;;  %1814 = vmatpush.msra.mxu3 %v41_v24  ;;  %181 = vmatpush.msra.mxu0 %v41_v24  ;;  %s2699_s22 = smov 16  }
   0xb   :  { %72 = vadd.xlane.f32.xlu0 %v71_v3  ;;  %v78_v6 = vmul.f32 32.0, %v1875_v5  ;;  %vm82_vm1 = vweird.f32 %v1875_v5 }
   0xd   :  { %v79_v7 = vsub.f32 1.0, %v78_v6 }
   0xf   :  { %v80_v8 = vmul.f32 %v1875_v5, %v79_v7 }
  0x11   :  { %v81_v9 = vadd.f32 %v1875_v5, %v80_v8 }
  0x13   :  { %v2102_v10 = vsel %vm82_vm1, %v1875_v5, %v81_v9  ;;  %vm617_vm1 = vcmask 195584  }
  0x76   :  { %v76_v11 = vpop.xlane.xlu0 %75 }
  0x77   :  { %v85_v12 = vmul.f32 %v2102_v10, %v76_v11 }
  0x79   :  { %v2106_v13 = vsub.f32 %v2091_v0, %v85_v12 }
  0x7b   :  { %v89_v14 = vmul.f32 %v2106_v13, %v2106_v13 }
  0x7d   :  { %v93_v15 = vsel %vm70_vm0, %v89_v14, 0.0 }
  0x7e   :  { %94 = vadd.xlane.f32.xlu1 %v93_v15  ;;  %v73_v16 = vpop.xlane.xlu0 %72 }
  0x7f   :  { %v84_v17 = vmul.f32 %v2102_v10, %v73_v16 }
  0x81   :  { %v2113_v18 = vsub.f32 %v2098_v2, %v84_v17 }
  0x83   :  { %v88_v19 = vmul.f32 %v2113_v18, %v2113_v18 }
  0x85   :  { %v90_v20 = vsel %vm70_vm0, %v88_v19, 0.0 }
  0x86   :  { %91 = vadd.xlane.f32.xlu1 %v90_v20 }
  0xf1   :  { %v95_v25 = vpop.xlane.xlu1 %94 }
  0xf2   :  { %v97_v26 = vmul.f32 %v95_v25, %v2102_v10 }
  0xf4   :  { %v99_v27 = vadd.f32 1e-05, %v97_v26 }
  0xf6   :  { %1876 = vrsqrt.f32 %v99_v27  ;;  %vm119_vm2 = vcmp.eq.f32.partialorder %v99_v27, inf  ;;  %v122_v41 = vand.u32 2147483648, %v99_v27  ;;  %vm121_vm3 = vcmp.eq.f32.partialorder %v99_v27, 0.0 }
  0xf9   :  { %v92_v28 = vpop.xlane.xlu1 %91 }
  0xfa   :  { %v96_v29 = vmul.f32 %v92_v28, %v2102_v10 }
  0xfc   :  { %v1877_v30 = vpop.eup %1876  ;;  %v98_v31 = vadd.f32 1e-05, %v96_v29 }
  0xfd   :  { %v113_v32 = vmul.f32 %v1877_v30, %v99_v27 }
  0xfe   :  { %1878 = vrsqrt.f32 %v98_v31  ;;  %vm107_vm4 = vcmp.eq.f32.partialorder %v98_v31, inf  ;;  %v110_v48 = vand.u32 2147483648, %v98_v31  ;;  %vm109_vm5 = vcmp.eq.f32.partialorder %v98_v31, 0.0 }
  0xff   :  { %v114_v33 = vmul.f32 %v1877_v30, %v113_v32 }
 0x101   :  { %v115_v34 = vmul.f32 0.5, %v114_v33 }
 0x103   :  { %v116_v35 = vsub.f32 1.5, %v115_v34 }
 0x104   :  { %v1879_v36 = vpop.eup %1878 }
 0x105   :  { %v101_v37 = vmul.f32 %v1879_v36, %v98_v31  ;;  %v117_v38 = vmul.f32 %v1877_v30, %v116_v35 }
 0x107   :  { %v102_v39 = vmul.f32 %v1879_v36, %v101_v37  ;;  %v118_v40 = vmul.f32 %v117_v38, %v99_v27 }
 0x109   :  { %v103_v42 = vmul.f32 0.5, %v102_v39  ;;  %v120_v43 = vsel %vm119_vm2, %v99_v27, %v118_v40 }
 0x10a   :  { %v123_v44 = vsel %vm121_vm3, %v122_v41, %v120_v43 }
 0x10b   :  { %v104_v45 = vsub.f32 1.5, %v103_v42  ;;  %1880 = vrcp.f32 %v123_v44  ;;  %v150_v54 = vand.u32 2147483648, %v123_v44  ;;  %v148_v56 = vand.u32 2147483647, %v123_v44 }
 0x10c   :  { %vm144_vm7 = vweird.f32 %v123_v44 }
 0x10d   :  { %v105_v46 = vmul.f32 %v1879_v36, %v104_v45  ;;  %v151_v60 = vor.u32 1.1754944e-38, %v150_v54  ;;  %vm149_vm9 = vcmp.eq.f32.partialorder %v148_v56, 8.507059e+37  ;;  %v38_v36 = vld [vmem:[%s2687_s1] sm:$0xff]  ;;  %v39_v45 = vld [vmem:[%s2687_s1 + $0x8] sm:$0xff] }
 0x10f   :  { %v106_v47 = vmul.f32 %v105_v46, %v98_v31 }
 0x111   :  { %v1881_v49 = vpop.eup %1880  ;;  %v108_v50 = vsel %vm107_vm4, %v98_v31, %v106_v47 }
 0x112   :  { %v140_v51 = vmul.f32 %v1881_v49, %v123_v44  ;;  %v111_v52 = vsel %vm109_vm5, %v110_v48, %v108_v50  ;;  %vm145_vm6 = vweird.f32 %v1881_v49 }
 0x113   :  { %1882 = vrcp.f32 %v111_v52  ;;  %vm146_vm8 = vmor %vm144_vm7, %vm145_vm6  ;;  %v135_v6 = vand.u32 2147483648, %v111_v52  ;;  %v133_v9 = vand.u32 2147483647, %v111_v52  ;;  %vm129_vm11 = vweird.f32 %v111_v52 }
 0x114   :  { %v141_v53 = vsub.f32 1.0, %v140_v51 }
 0x115   :  { %v136_v14 = vor.u32 1.1754944e-38, %v135_v6  ;;  %vm134_vm13 = vcmp.eq.f32.partialorder %v133_v9, 8.507059e+37 }
 0x116   :  { %v142_v55 = vmul.f32 %v1881_v49, %v141_v53 }
 0x118   :  { %v143_v58 = vadd.f32 %v1881_v49, %v142_v55 }
 0x119   :  { %v1883_v59 = vpop.eup %1882 }
 0x11a   :  { %v147_v61 = vsel %vm146_vm8, %v1881_v49, %v143_v58  ;;  %v125_v63 = vmul.f32 %v1883_v59, %v111_v52  ;;  %vm130_vm10 = vweird.f32 %v1883_v59 }
 0x11b   :  { %v152_v1 = vsel %vm149_vm9, %v151_v60, %v147_v61  ;;  %vm131_vm12 = vmor %vm129_vm11, %vm130_vm10 }
 0x11c   :  { %v153_v3 = vmul.f32 %v152_v1, %v2106_v13  ;;  %v126_v5 = vsub.f32 1.0, %v125_v63 }
 0x11e   :  { %v156_v7 = vmul.f32 %v154_v62, %v153_v3  ;;  %v127_v8 = vmul.f32 %v1883_v59, %v126_v5 }
 0x120   :  { %v159_v11 = vadd.f32 %v157_v4, %v156_v7  ;;  %v128_v12 = vadd.f32 %v1883_v59, %v127_v8 }
 0x122   :  { %1720 = vmatmul.msk.f32.vlgmr.msra.gmra.mxu3 %vm70_vm0, %v159_v11  ;;  %v132_v15 = vsel %vm131_vm12, %v1883_v59, %v128_v12 }
 0x123   :  { %v137_v16 = vsel %vm134_vm13, %v136_v14, %v132_v15 }
 0x124   :  { %v138_v13 = vmul.f32 %v137_v16, %v2113_v18 }
 0x126   :  { %v155_v17 = vmul.f32 %v154_v62, %v138_v13 }
 0x128   :  { %v158_v19 = vadd.f32 %v157_v4, %v155_v17 }
 0x12a   :  { %1719 = vmatmul.msk.f32.vlgmr.msra.gmra.mxu0 %vm70_vm0, %v158_v19 }
 0x1a5   :  { %v2143_v20 = vpop.f32.mrf.mxu3 }
 0x1a6   :  { %193 = vrot.lane.b32.xlu1 %v2143_v20, %s2017_s26 }
 0x1a7   :  { %v2147_v21 = vpop.f32.mrf.mxu0 }
 0x1a8   :  { %289 = vrot.lane.b32.xlu0 %v2147_v21, %s2018_s27  ;;  %293 = vrot.lane.b32.xlu2 %v2147_v21, %s2019_s28  ;;  %v1842_v8 = vpack.i.bf16 %v2147_v21, %v2143_v20 }
 0x1ae   :  { %395 = vrot.lane.b32.xlu1 %v2143_v20, %s2020_s29 }
 0x1b0   :  { %493 = vrot.lane.b32.xlu0 %v2147_v21, %s2021_s30  ;;  %295 = vrot.lane.b32.xlu2 %v2143_v20, %s2019_s28 }
 0x1b6   :  { %389 = vrot.lane.b32.xlu1 %v2147_v21, %s2022_s11 }
 0x1b8   :  { %393 = vrot.lane.b32.xlu0 %v2147_v21, %s2020_s29  ;;  %191 = vrot.lane.b32.xlu2 %v2147_v21, %s2017_s26 }
 0x1c0   :  { %391 = vrot.lane.b32.xlu0 %v2143_v20, %s2022_s11  ;;  %291 = vrot.lane.b32.xlu2 %v2143_v20, %s2018_s27 }
 0x1c8   :  { %495 = vrot.lane.b32.xlu2 %v2143_v20, %s2021_s30 }
 0x1d0   :  { %489 = vrot.lane.b32.xlu2 %v2147_v21, %s2023_s12 }
 0x1d8   :  { %491 = vrot.lane.b32.xlu2 %v2143_v20, %s2023_s12 }
 0x202   :  { %v294_v18 = vpop.permute.xlu2 %293 }
 0x20a   :  { %v296_v22 = vpop.permute.xlu2 %295 }
 0x20b   :  { %1727 = vmatpush.xpose.msk.msrb.mxu3 %vm195_vm14, %v296_v22 }
 0x20f   :  { %1728 = vmatpush.xpose.msk.msrb.mxu3 %vm195_vm14, %v294_v18 }
 0x212   :  { %v192_v23 = vpop.permute.xlu2 %191 }
 0x218   :  { %v194_v24 = vpop.permute.xlu1 %193 }
 0x219   :  { %1721 = vmatpush.xpose.msk.msra.mxu1 %vm195_vm14, %v194_v24 }
 0x21a   :  { %v290_v25 = vpop.permute.xlu0 %289  ;;  %v292_v26 = vpop.permute.xlu2 %291 }
 0x21b   :  { %1729 = vmatmul.msk.f32.vlgmr.msrb.gmra.mxu3 %vm195_vm14, %v290_v25 }
 0x21d   :  { %1722 = vmatpush.xpose.msk.msra.mxu1 %vm195_vm14, %v192_v23 }
 0x220   :  { %1723 = vmatmul.msk.f32.vlgmr.msra.gmra.mxu1 %vm195_vm14, %v2147_v21  ;;  %v396_v27 = vpop.permute.xlu1 %395 }
 0x221   :  { %1733 = vmatpush.xpose.msk.msrb.mxu0 %vm195_vm14, %v396_v27 }
 0x222   :  { %v494_v28 = vpop.permute.xlu0 %493  ;;  %v496_v29 = vpop.permute.xlu2 %495 }
 0x223   :  { %1730 = vmatmul.msk.f32.gmra.mxu3 %vm195_vm14, %v292_v26 }
 0x224   :  { %1739 = vmatpush.xpose.msk.msra.mxu3 %vm195_vm14, %v496_v29 }
 0x228   :  { %1740 = vmatpush.xpose.msk.msra.mxu3 %vm195_vm14, %v494_v28  ;;  %1724 = vmatmul.msk.f32.gmra.mxu1 %vm195_vm14, %v2143_v20  ;;  %v390_v32 = vpop.permute.xlu1 %389 }
 0x22a   :  { %v394_v30 = vpop.permute.xlu0 %393  ;;  %v490_v31 = vpop.permute.xlu2 %489 }
 0x22b   :  { %1734 = vmatpush.xpose.msk.msrb.mxu0 %vm195_vm14, %v394_v30  ;;  %1741 = vmatmul.msk.f32.vlgmr.msra.gmra.mxu3 %vm195_vm14, %v490_v31 }
 0x22e   :  { %1735 = vmatmul.msk.f32.vlgmr.msrb.gmra.mxu0 %vm195_vm14, %v390_v32 }
 0x232   :  { %v492_v33 = vpop.permute.xlu2 %491  ;;  %v392_v34 = vpop.permute.xlu0 %391 }
 0x233   :  { %1742 = vmatmul.msk.f32.gmra.mxu3 %vm195_vm14, %v492_v33 }
 0x236   :  { %1736 = vmatmul.msk.f32.gmra.mxu0 %vm195_vm14, %v392_v34 }
 0x29d   :  { %v221_v35 = vpop.f32.mrf.mxu1 }
 0x29e   :  { %v227_v37 = vmul.f32 0.35355338, %v221_v35  ;;  %v322_v38 = vpop.f32.mrf.mxu3 }
 0x29f   :  { %v328_v39 = vmul.f32 0.35355338, %v322_v38 }
 0x2a0   :  { %v229_v40 = vadd.f32 %v227_v37, %v38_v36 }
 0x2a1   :  { %v330_v41 = vadd.f32 %v328_v39, %v38_v36 }
 0x2a2   :  { %v232_v42 = vsel %vm231_vm15, %v229_v40, -inf }
 0x2a3   :  { %233 = vmax.xlane.f32.xlu1 %v232_v42  ;;  %v332_v43 = vsel %vm231_vm15, %v330_v41, -inf }
 0x2a4   :  { %333 = vmax.xlane.f32.xlu2 %v332_v43 }
 0x2a5   :  { %v224_v44 = vpop.f32.mrf.mxu1 }
 0x2a6   :  { %v228_v46 = vmul.f32 0.35355338, %v224_v44  ;;  %v325_v47 = vpop.f32.mrf.mxu3 }
 0x2a7   :  { %v329_v54 = vmul.f32 0.35355338, %v325_v47 }
 0x2a8   :  { %v230_v48 = vadd.f32 %v228_v46, %v39_v45 }
 0x2a9   :  { %v331_v59 = vadd.f32 %v329_v54, %v39_v45 }
 0x2aa   :  { %v235_v49 = vsel %vm231_vm15, %v230_v48, -inf }
 0x2ab   :  { %v422_v50 = vpop.f32.mrf.mxu0  ;;  %v335_v1 = vsel %vm231_vm15, %v331_v59, -inf }
 0x2ac   :  { %v428_v51 = vmul.f32 0.35355338, %v422_v50  ;;  %236 = vmax.xlane.f32.xlu2 %v235_v49 }
 0x2ae   :  { %v522_v52 = vpop.f32.mrf.mxu3  ;;  %v430_v53 = vadd.f32 %v428_v51, %v38_v36 }
 0x2af   :  { %v528_v63 = vmul.f32 0.35355338, %v522_v52 }
 0x2b0   :  { %v432_v55 = vsel %vm231_vm15, %v430_v53, -inf }
 0x2b1   :  { %433 = vmax.xlane.f32.xlu0 %v432_v55  ;;  %v530_v6 = vadd.f32 %v528_v63, %v38_v36 }
 0x2b3   :  { %v425_v56 = vpop.f32.mrf.mxu0  ;;  %v532_v7 = vsel %vm231_vm15, %v530_v6, -inf }
 0x2b4   :  { %v429_v58 = vmul.f32 0.35355338, %v425_v56 }
 0x2b6   :  { %v525_v60 = vpop.f32.mrf.mxu3  ;;  %v2203_v61 = vadd.f32 %v429_v58, %v39_v45 }
 0x2b7   :  { %v529_v62 = vmul.f32 0.35355338, %v525_v60 }
 0x2b8   :  { %v435_v3 = vsel %vm231_vm15, %v2203_v61, -inf }
 0x2b9   :  { %336 = vmax.xlane.f32.xlu0 %v335_v1  ;;  %436 = vmax.xlane.f32.xlu1 %v435_v3  ;;  %v2208_v4 = vadd.f32 %v529_v62, %v39_v45 }
 0x2bb   :  { %v535_v5 = vsel %vm231_vm15, %v2208_v4, -inf }
 0x2bc   :  { %536 = vmax.xlane.f32.xlu2 %v535_v5 }
 0x2c1   :  { %533 = vmax.xlane.f32.xlu1 %v532_v7 }
 0x2cd   :  { %1843 = vrot.lane.b32.xlu0 %v1842_v8, %s2024_s0 }
 0x2da   :  { %1833 = vrot.lane.b32.xlu1 %v1842_v8, %s2025_s17 }
 0x316   :  { %v234_v9 = vpop.xlane.xlu1 %233 }
 0x317   :  { %v238_v11 = vsub.f32 %v229_v40, %v234_v9  ;;  %v334_v12 = vpop.xlane.xlu2 %333 }
 0x318   :  { %v338_v14 = vsub.f32 %v330_v41, %v334_v12 }
 0x319   :  { %v240_v15 = vmul.f32 1.442695, %v238_v11 }
 0x31a   :  { %v340_v16 = vmul.f32 1.442695, %v338_v14 }
 0x31b   :  { %1884 = vpow2.f32 %v240_v15 }
 0x31c   :  { %1886 = vpow2.f32 %v340_v16 }
 0x31f   :  { %v237_v13 = vpop.xlane.xlu2 %236 }
 0x320   :  { %v239_v17 = vsub.f32 %v230_v48, %v237_v13 }
 0x321   :  { %v2217_v19 = vpop.eup %1884 }
 0x322   :  { %v2219_v18 = vpop.eup %1886  ;;  %v242_v20 = vmul.f32 1.442695, %v239_v17  ;;  %v244_v21 = vsel %vm231_vm15, %v2217_v19, 0.0 }
 0x323   :  { %245 = vadd.xlane.f32.xlu2 %v244_v21  ;;  %v344_v22 = vsel %vm231_vm15, %v2219_v18, 0.0 }
 0x324   :  { %1888 = vpow2.f32 %v242_v20  ;;  %345 = vadd.xlane.f32.xlu0 %v344_v22  ;;  %v434_v23 = vpop.xlane.xlu0 %433 }
 0x325   :  { %v438_v24 = vsub.f32 %v430_v53, %v434_v23 }
 0x327   :  { %v440_v25 = vmul.f32 1.442695, %v438_v24 }
 0x329   :  { %1890 = vpow2.f32 %v440_v25 }
 0x32a   :  { %v2225_v26 = vpop.eup %1888 }
 0x32b   :  { %v247_v27 = vsel %vm231_vm15, %v2225_v26, 0.0 }
 0x32c   :  { %248 = vadd.xlane.f32.xlu0 %v247_v27  ;;  %v337_v28 = vpop.xlane.xlu0 %336  ;;  %v437_v29 = vpop.xlane.xlu1 %436 }
 0x32d   :  { %v339_v30 = vsub.f32 %v331_v59, %v337_v28  ;;  %v439_v52 = vsub.f32 %v2203_v61, %v437_v29 }
 0x32f   :  { %v2229_v31 = vpop.eup %1890  ;;  %v342_v32 = vmul.f32 1.442695, %v339_v30  ;;  %v537_v44 = vpop.xlane.xlu2 %536  ;;  %v442_v53 = vmul.f32 1.442695, %v439_v52 }
 0x330   :  { %v444_v33 = vsel %vm231_vm15, %v2229_v31, 0.0  ;;  %v539_v47 = vsub.f32 %v2208_v4, %v537_v44 }
 0x331   :  { %1892 = vpow2.f32 %v342_v32  ;;  %445 = vadd.xlane.f32.xlu1 %v444_v33 }
 0x332   :  { %v542_v49 = vmul.f32 1.442695, %v539_v47 }
 0x334   :  { %v534_v34 = vpop.xlane.xlu1 %533 }
 0x335   :  { %v538_v35 = vsub.f32 %v530_v6, %v534_v34  ;;  %v48_v34 = vld [vmem:[%s2690_s4 + $0x18] sm:$0xff] }
 0x336   :  { %638 = vmatpush.msra.mxu0 %v48_v34 }
 0x337   :  { %v1893_v36 = vpop.eup %1892  ;;  %v540_v37 = vmul.f32 1.442695, %v538_v35  ;;  %v47_v35 = vld [vmem:[%s2690_s4 + $0x10] sm:$0xff] }
 0x338   :  { %v347_v38 = vsel %vm231_vm15, %v1893_v36, 0.0  ;;  %639 = vmatpush.msra.mxu0 %v47_v35 }
 0x339   :  { %1894 = vpow2.f32 %v540_v37  ;;  %348 = vadd.xlane.f32.xlu0 %v347_v38  ;;  %v45_v37 = vld [vmem:[%s2690_s4] sm:$0xff] }
 0x33a   :  { %1896 = vpow2.f32 %v542_v49 }
 0x33b   :  { %1838 = vrot.lane.b32.xlu2 %v1842_v8, %s2026_s18  ;;  %1898 = vpow2.f32 %v442_v53 }
 0x33f   :  { %v1895_v39 = vpop.eup %1894  ;;  %v1844_v42 = vpop.permute.xlu0 %1843 }
 0x340   :  { %v544_v40 = vsel %vm231_vm15, %v1895_v39, 0.0  ;;  %v1845_v46 = vunpack.i.l.bf16 %v1844_v42  ;;  %v1846_v48 = vunpack.i.h.bf16 %v1844_v42  ;;  %v1897_v50 = vpop.eup %1896 }
 0x341   :  { %545 = vadd.xlane.f32.xlu0 %v544_v40  ;;  %v547_v51 = vsel %vm231_vm15, %v1897_v50, 0.0  ;;  %v1899_v54 = vpop.eup %1898 }
 0x342   :  { %v447_v55 = vsel %vm231_vm15, %v1899_v54, 0.0 }
 0x34c   :  { %v1834_v41 = vpop.permute.xlu1 %1833 }
 0x34d   :  { %v1835_v43 = vunpack.i.l.bf16 %v1834_v41  ;;  %v1836_v45 = vunpack.i.h.bf16 %v1834_v41 }
 0x34f   :  { %380 = vmatpush.msra.mxu2 %v1835_v43 }
 0x351   :  { %381 = vmatpush.msra.mxu2 %v1836_v45 }
 0x353   :  { %580 = vmatpush.msrb.mxu2 %v1845_v46 }
 0x355   :  { %581 = vmatpush.msrb.mxu2 %v1846_v48  ;;  %1848 = vrot.lane.b32.xlu0 %v1842_v8, %s2027_s19 }
 0x364   :  { %548 = vadd.xlane.f32.xlu2 %v547_v51 }
 0x37f   :  { %448 = vadd.xlane.f32.xlu0 %v447_v55 }
 0x396   :  { %v246_v56 = vpop.xlane.xlu2 %245 }
 0x397   :  { %v346_v58 = vpop.xlane.xlu0 %345 }
 0x398   :  { %1900 = vrcp.f32 %v346_v58 }
 0x399   :  { %1902 = vrcp.f32 %v246_v56 }
 0x39e   :  { %v1901_v59 = vpop.eup %1900  ;;  %v1839_v60 = vpop.permute.xlu2 %1838 }
 0x39f   :  { %v1903_v62 = vpop.eup %1902  ;;  %v249_v63 = vpop.xlane.xlu0 %248  ;;  %v1840_v1 = vunpack.i.l.bf16 %v1839_v60  ;;  %v352_v3 = vmul.f32 %v1901_v59, %v2219_v18  ;;  %v1841_v61 = vunpack.i.h.bf16 %v1839_v60 }
 0x3a0   :  { %1904 = vrcp.f32 %v249_v63  ;;  %v252_v4 = vmul.f32 %v1903_v62, %v2217_v19 }
 0x3a1   :  { %280 = vmatpush.msrb.mxu1 %v1840_v1  ;;  %1731 = vmatmul.msk.f32.vlgmr.msra.gmra.mxu2 %vm231_vm15, %v352_v3 }
 0x3a3   :  { %281 = vmatpush.msrb.mxu1 %v1841_v61 }
 0x3a4   :  { %1725 = vmatmul.msk.f32.vlgmr.msrb.gmra.mxu1 %vm231_vm15, %v252_v4  ;;  %v446_v15 = vpop.xlane.xlu1 %445 }
 0x3a6   :  { %v1905_v5 = vpop.eup %1904 }
 0x3a7   :  { %v253_v6 = vmul.f32 %v1905_v5, %v2225_v26 }
 0x3ac   :  { %v349_v7 = vpop.xlane.xlu0 %348  ;;  %1726 = vmatmul.msk.f32.gmra.mxu1 %vm231_vm15, %v253_v6  ;;  %v52_v6 = vld [vmem:[%s2691_s5 + $0x18] sm:$0xff] }
 0x3ad   :  { %1906 = vrcp.f32 %v349_v7  ;;  %v51_v7 = vld [vmem:[%s2691_s5 + $0x10] sm:$0xff] }
 0x3b3   :  { %v1907_v8 = vpop.eup %1906 }
 0x3b4   :  { %v546_v9 = vpop.xlane.xlu0 %545  ;;  %v353_v11 = vmul.f32 %v1907_v8, %v1893_v36  ;;  %v46_v36 = vld [vmem:[%s2690_s4 + $0x8] sm:$0xff] }
 0x3b5   :  { %1908 = vrcp.f32 %v546_v9  ;;  %640 = vmatpush.msra.mxu0 %v46_v36  ;;  %v50_v8 = vld [vmem:[%s2691_s5 + $0x8] sm:$0xff]  ;;  %v49_v9 = vld [vmem:[%s2691_s5] sm:$0xff]  ;;  %v733_v36 = vperm.slane %v2135_v57, 3 }
 0x3b6   :  { %1732 = vmatmul.msk.f32.gmra.mxu2 %vm231_vm15, %v353_v11  ;;  %1910 = vrcp.f32 %v446_v15 }
 0x3b7   :  { %641 = vmatpush.msra.mxu0 %v45_v37 }
 0x3bb   :  { %v1909_v12 = vpop.eup %1908 }
 0x3bc   :  { %v552_v14 = vmul.f32 %v1909_v12, %v1895_v39  ;;  %v1911_v13 = vpop.eup %1910 }
 0x3bd   :  { %v452_v18 = vmul.f32 %v1911_v13, %v2229_v31 }
 0x3be   :  { %1743 = vmatmul.msk.f32.vlgmr.msrb.gmra.mxu2 %vm231_vm15, %v552_v14 }
 0x3c7   :  { %v1849_v16 = vpop.permute.xlu0 %1848 }
 0x3c8   :  { %v1850_v17 = vunpack.i.l.bf16 %v1849_v16  ;;  %v1851_v19 = vunpack.i.h.bf16 %v1849_v16 }
 0x3ca   :  { %480 = vmatpush.msra.mxu1 %v1850_v17 }
 0x3cc   :  { %481 = vmatpush.msra.mxu1 %v1851_v19 }
 0x3cd   :  { %1737 = vmatmul.msk.f32.vlgmr.msra.gmra.mxu1 %vm231_vm15, %v452_v18 }
 0x3ce   :  { %757 = vmatpush.msrb.mxu1 %v52_v6 }
 0x3d0   :  { %758 = vmatpush.msrb.mxu1 %v51_v7 }
 0x3d2   :  { %759 = vmatpush.msrb.mxu1 %v50_v8 }
 0x3d4   :  { %760 = vmatpush.msrb.mxu1 %v49_v9  ;;  %v65_v9 = vld [vmem:[%s2693_s7 + $0x58] sm:$0xff] }
 0x3d7   :  { %v549_v20 = vpop.xlane.xlu2 %548 }
 0x3d8   :  { %1912 = vrcp.f32 %v549_v20 }
 0x3de   :  { %v1913_v21 = vpop.eup %1912 }
 0x3df   :  { %v553_v22 = vmul.f32 %v1913_v21, %v1897_v50  ;;  %v651_v50 = vperm.slane %v2135_v57, 4 }
 0x3e1   :  { %1744 = vmatmul.msk.f32.gmra.mxu2 %vm231_vm15, %v553_v22 }
 0x3f2   :  { %v449_v23 = vpop.xlane.xlu0 %448 }
 0x3f3   :  { %1914 = vrcp.f32 %v449_v23 }
 0x3f9   :  { %v1915_v24 = vpop.eup %1914 }
 0x3fa   :  { %v453_v25 = vmul.f32 %v1915_v24, %v1899_v54 }
 0x3fc   :  { %1738 = vmatmul.msk.f32.gmra.mxu1 %vm231_vm15, %v453_v25 }
 0x421   :  { %v283_v27 = vpop.f32.mrf.mxu1 }
 0x424   :  { %v383_v26 = vpop.f32.mrf.mxu2 }
 0x425   :  { %591 = vrot.lane.b32.xlu1 %v383_v26, %s2701_s20 }
 0x429   :  { %v286_v30 = vpop.f32.mrf.mxu1 }
 0x439   :  { %v386_v28 = vpop.f32.mrf.mxu2 }
 0x441   :  { %v583_v29 = vpop.f32.mrf.mxu2 }
 0x442   :  { %607 = vrot.lane.b32.xlu1 %v583_v29, %s2697_s21 }
 0x44a   :  { %v483_v31 = vpop.f32.mrf.mxu1 }
 0x44b   :  { %599 = vrot.lane.b32.xlu2 %v483_v31, %s2699_s22 }
 0x453   :  { %593 = vrot.lane.b32.xlu2 %v386_v28, %s2701_s20  ;;  %s1707_s20 = sshll.u32 %s2696_s10, 4  ;;  %s1708_s20 = int_to_ptr.hbm [resolvable:$true] %s1707_s20 }
 0x464   :  { %v586_v32 = vpop.f32.mrf.mxu2 }
 0x465   :  { %609 = vrot.lane.b32.xlu1 %v586_v32, %s2697_s21 }
 0x479   :  { %v486_v33 = vpop.f32.mrf.mxu1 }
 0x47a   :  { %601 = vrot.lane.b32.xlu0 %v486_v33, %s2699_s22  ;;  %v730_v33 = vperm.slane %v2135_v57, 2  ;;  %s2032_s22 = smov 128  }
 0x497   :  { %v592_v38 = vpop.permute.xlu1 %591 }
 0x498   :  { %v613_v40 = vsel %vm195_vm14, %v283_v27, %v592_v38 }
 0x4a5   :  { %v600_v39 = vpop.permute.xlu2 %599 }
 0x4a6   :  { %v615_v41 = vsel %vm231_vm15, %v613_v40, %v600_v39 }
 0x4ad   :  { %v594_v44 = vpop.permute.xlu2 %593 }
 0x4ae   :  { %v614_v45 = vsel %vm195_vm14, %v286_v30, %v594_v44 }
 0x4b4   :  { %v608_v42 = vpop.permute.xlu1 %607 }
 0x4b5   :  { %v618_v43 = vsel %vm617_vm1, %v615_v41, %v608_v42 }
 0x4b6   :  { %1745 = vmatmul.msk.f32.vlgmr.msra.gmra.mxu0 %vm70_vm0, %v618_v43 }
 0x4d7   :  { %v610_v47 = vpop.permute.xlu1 %609 }
 0x4ec   :  { %v602_v46 = vpop.permute.xlu0 %601 }
 0x4ed   :  { %v616_v48 = vsel %vm231_vm15, %v614_v45, %v602_v46  ;;  %v69_v46 = vld [vmem:[%s2693_s7 + $0x78] sm:$0xff] }
 0x4ee   :  { %v619_v49 = vsel %vm617_vm1, %v616_v48, %v610_v47  ;;  %v68_v47 = vld [vmem:[%s2693_s7 + $0x70] sm:$0xff]  ;;  %786 = vmatpush.msrb.mxu3 %v69_v46 }
 0x4ef   :  { %1746 = vmatmul.msk.f32.gmra.mxu0 %vm70_vm0, %v619_v49  ;;  %v67_v49 = vld [vmem:[%s2693_s7 + $0x68] sm:$0xff] }
 0x4f0   :  { %787 = vmatpush.msrb.mxu3 %v68_v47 }
 0x4f2   :  { %788 = vmatpush.msrb.mxu3 %v67_v49 }
 0x533   :  { %v643_v51 = vpop.f32.mrf.mxu0 }
 0x534   :  { %v649_v52 = vadd.f32 %v643_v51, %v2098_v2  ;;  %v66_v51 = vld [vmem:[%s2693_s7 + $0x60] sm:$0xff] }
 0x535   :  { %789 = vmatpush.msrb.mxu3 %v66_v51 }
 0x536   :  { %v2281_v53 = vadd.f32 %v651_v50, %v649_v52 }
 0x537   :  { %790 = vmatpush.msrb.mxu3 %v65_v9 }
 0x538   :  { %v654_v54 = vsel %vm70_vm0, %v2281_v53, 0.0 }
 0x539   :  { %655 = vadd.xlane.f32.xlu2 %v654_v54 }
 0x56c   :  { %v646_v55 = vpop.f32.mrf.mxu0 }
 0x56d   :  { %v650_v56 = vadd.f32 %v646_v55, %v2091_v0 }
 0x56f   :  { %v2286_v58 = vadd.f32 %v651_v50, %v650_v56 }
 0x571   :  { %v657_v59 = vsel %vm70_vm0, %v2286_v58, 0.0 }
 0x572   :  { %658 = vadd.xlane.f32.xlu1 %v657_v59 }
 0x5ac   :  { %v656_v60 = vpop.xlane.xlu2 %655 }
 0x5ad   :  { %v660_v62 = vmul.f32 %v656_v60, %v2102_v10 }
 0x5af   :  { %v662_v2 = vsub.f32 %v2281_v53, %v660_v62 }
 0x5b1   :  { %v664_v63 = vmul.f32 %v662_v2, %v662_v2 }
 0x5b3   :  { %v666_v1 = vsel %vm70_vm0, %v664_v63, 0.0 }
 0x5b4   :  { %667 = vadd.xlane.f32.xlu0 %v666_v1 }
 0x5e5   :  { %v659_v3 = vpop.xlane.xlu1 %658 }
 0x5e6   :  { %v661_v61 = vmul.f32 %v659_v3, %v2102_v10 }
 0x5e8   :  { %v2295_v0 = vsub.f32 %v2286_v58, %v661_v61 }
 0x5ea   :  { %v665_v4 = vmul.f32 %v2295_v0, %v2295_v0 }
 0x5ec   :  { %v669_v5 = vsel %vm70_vm0, %v665_v4, 0.0 }
 0x5ed   :  { %670 = vadd.xlane.f32.xlu2 %v669_v5 }
 0x627   :  { %v668_v11 = vpop.xlane.xlu0 %667 }
 0x628   :  { %v672_v12 = vmul.f32 %v668_v11, %v2102_v10  ;;  %v64_v11 = vld [vmem:[%s2693_s7 + $0x50] sm:$0xff] }
 0x629   :  { %791 = vmatpush.msrb.mxu3 %v64_v11 }
 0x62a   :  { %v674_v14 = vadd.f32 1e-05, %v672_v12  ;;  %v63_v12 = vld [vmem:[%s2693_s7 + $0x48] sm:$0xff] }
 0x62b   :  { %792 = vmatpush.msrb.mxu3 %v63_v12 }
 0x62c   :  { %1916 = vrsqrt.f32 %v674_v14  ;;  %vm683_vm2 = vcmp.eq.f32.partialorder %v674_v14, inf  ;;  %v686_v21 = vand.u32 2147483648, %v674_v14  ;;  %vm685_vm3 = vcmp.eq.f32.partialorder %v674_v14, 0.0 }
 0x632   :  { %v1917_v15 = vpop.eup %1916 }
 0x633   :  { %v677_v16 = vmul.f32 %v1917_v15, %v674_v14 }
 0x635   :  { %v678_v13 = vmul.f32 %v1917_v15, %v677_v16  ;;  %v59_v16 = vld [vmem:[%s2693_s7 + $0x28] sm:$0xff] }
 0x637   :  { %v679_v17 = vmul.f32 0.5, %v678_v13  ;;  %v58_v13 = vld [vmem:[%s2693_s7 + $0x20] sm:$0xff] }
 0x639   :  { %v680_v19 = vsub.f32 1.5, %v679_v17  ;;  %v57_v17 = vld [vmem:[%s2693_s7 + $0x18] sm:$0xff] }
 0x63b   :  { %v681_v18 = vmul.f32 %v1917_v15, %v680_v19  ;;  %v60_v15 = vld [vmem:[%s2693_s7 + $0x30] sm:$0xff] }
 0x63c   :  { %v56_v19 = vld [vmem:[%s2693_s7 + $0x10] sm:$0xff] }
 0x63d   :  { %v682_v20 = vmul.f32 %v681_v18, %v674_v14  ;;  %v55_v18 = vld [vmem:[%s2693_s7 + $0x8] sm:$0xff] }
 0x63f   :  { %v684_v22 = vsel %vm683_vm2, %v674_v14, %v682_v20  ;;  %v61_v14 = vld [vmem:[%s2693_s7 + $0x38] sm:$0xff]  ;;  %v54_v20 = vld [vmem:[%s2693_s7] sm:$0xff] }
 0x640   :  { %v687_v23 = vsel %vm685_vm3, %v686_v21, %v684_v22  ;;  %v1872_v21 = vld [vmem:[%s2692_s6] ss:$0 sm:$0xff] }
 0x641   :  { %1918 = vrcp.f32 %v687_v23  ;;  %v711_v27 = vand.u32 2147483648, %v687_v23  ;;  %v709_v29 = vand.u32 2147483647, %v687_v23  ;;  %vm705_vm5 = vweird.f32 %v687_v23 }
 0x643   :  { %v712_v31 = vor.u32 1.1754944e-38, %v711_v27  ;;  %vm710_vm7 = vcmp.eq.f32.partialorder %v709_v29, 8.507059e+37 }
 0x647   :  { %v1919_v24 = vpop.eup %1918 }
 0x648   :  { %v701_v25 = vmul.f32 %v1919_v24, %v687_v23  ;;  %vm706_vm4 = vweird.f32 %v1919_v24 }
 0x649   :  { %vm707_vm6 = vmor %vm705_vm5, %vm706_vm4 }
 0x64a   :  { %v702_v26 = vsub.f32 1.0, %v701_v25 }
 0x64c   :  { %v703_v28 = vmul.f32 %v1919_v24, %v702_v26 }
 0x64e   :  { %v704_v30 = vadd.f32 %v1919_v24, %v703_v28 }
 0x650   :  { %v708_v32 = vsel %vm707_vm6, %v1919_v24, %v704_v30 }
 0x651   :  { %v713_v34 = vsel %vm710_vm7, %v712_v31, %v708_v32 }
 0x652   :  { %v714_v35 = vmul.f32 %v713_v34, %v662_v2 }
 0x654   :  { %v731_v37 = vmul.f32 %v730_v33, %v714_v35 }
 0x656   :  { %v734_v38 = vadd.f32 %v733_v36, %v731_v37 }
 0x658   :  { %1747 = vmatmul.msk.f32.vlgmr.msrb.gmra.mxu1 %vm70_vm0, %v734_v38 }
 0x660   :  { %v671_v39 = vpop.xlane.xlu2 %670 }
 0x661   :  { %v673_v40 = vmul.f32 %v671_v39, %v2102_v10 }
 0x663   :  { %v675_v41 = vadd.f32 1e-05, %v673_v40 }
 0x665   :  { %1920 = vrsqrt.f32 %v675_v41  ;;  %vm695_vm8 = vcmp.eq.f32.partialorder %v675_v41, inf  ;;  %v698_v54 = vand.u32 2147483648, %v675_v41  ;;  %vm697_vm9 = vcmp.eq.f32.partialorder %v675_v41, 0.0 }
 0x66b   :  { %v1921_v42 = vpop.eup %1920 }
 0x66c   :  { %v689_v43 = vmul.f32 %v1921_v42, %v675_v41 }
 0x66e   :  { %v690_v44 = vmul.f32 %v1921_v42, %v689_v43 }
 0x670   :  { %v691_v45 = vmul.f32 0.5, %v690_v44  ;;  %v811_v44 = vperm.slane %v2135_v57, 5 }
 0x672   :  { %v692_v48 = vsub.f32 1.5, %v691_v45 }
 0x674   :  { %v693_v50 = vmul.f32 %v1921_v42, %v692_v48 }
 0x676   :  { %v694_v52 = vmul.f32 %v693_v50, %v675_v41 }
 0x678   :  { %v696_v55 = vsel %vm695_vm8, %v675_v41, %v694_v52 }
 0x679   :  { %v699_v56 = vsel %vm697_vm9, %v698_v54, %v696_v55 }
 0x67a   :  { %1922 = vrcp.f32 %v699_v56  ;;  %v726_v2 = vand.u32 2147483648, %v699_v56  ;;  %v724_v1 = vand.u32 2147483647, %v699_v56  ;;  %vm720_vm11 = vweird.f32 %v699_v56 }
 0x67c   :  { %v727_v61 = vor.u32 1.1754944e-38, %v726_v2  ;;  %vm725_vm13 = vcmp.eq.f32.partialorder %v724_v1, 8.507059e+37  ;;  %v1752_v1 = vld [vmem:[%s2689_s3 + $0x30] sm:$0xff] }
 0x680   :  { %v1923_v59 = vpop.eup %1922 }
 0x681   :  { %v716_v60 = vmul.f32 %v1923_v59, %v699_v56  ;;  %vm721_vm10 = vweird.f32 %v1923_v59 }
 0x682   :  { %vm722_vm12 = vmor %vm720_vm11, %vm721_vm10 }
 0x683   :  { %v717_v62 = vsub.f32 1.0, %v716_v60 }
 0x685   :  { %v718_v63 = vmul.f32 %v1923_v59, %v717_v62 }
 0x687   :  { %v719_v3 = vadd.f32 %v1923_v59, %v718_v63  ;;  %v1753_v63 = vld [vmem:[%s2689_s3 + $0x38] sm:$0xff] }
 0x688   :  { %950 = vmatpush.msra.mxu2 %v1753_v63 }
 0x689   :  { %v723_v4 = vsel %vm722_vm12, %v1923_v59, %v719_v3  ;;  %v1751_v3 = vld [vmem:[%s2689_s3 + $0x28] sm:$0xff] }
 0x68a   :  { %v728_v5 = vsel %vm725_vm13, %v727_v61, %v723_v4  ;;  %951 = vmatpush.msra.mxu2 %v1752_v1  ;;  %v1750_v61 = vld [vmem:[%s2689_s3 + $0x20] sm:$0xff] }
 0x68b   :  { %v729_v6 = vmul.f32 %v728_v5, %v2295_v0  ;;  %v62_v0 = vld [vmem:[%s2693_s7 + $0x40] sm:$0xff] }
 0x68c   :  { %793 = vmatpush.msrb.mxu3 %v62_v0  ;;  %952 = vmatpush.msra.mxu2 %v1751_v3 }
 0x68d   :  { %v732_v7 = vmul.f32 %v730_v33, %v729_v6 }
 0x68e   :  { %794 = vmatpush.msrb.mxu3 %v61_v14  ;;  %953 = vmatpush.msra.mxu2 %v1750_v61 }
 0x68f   :  { %v735_v8 = vadd.f32 %v733_v36, %v732_v7 }
 0x690   :  { %795 = vmatpush.msrb.mxu3 %v60_v15 }
 0x691   :  { %1748 = vmatmul.msk.f32.gmra.mxu1 %vm70_vm0, %v735_v8 }
 0x692   :  { %796 = vmatpush.msrb.mxu3 %v59_v16 }
 0x694   :  { %797 = vmatpush.msrb.mxu3 %v58_v13 }
 0x696   :  { %798 = vmatpush.msrb.mxu3 %v57_v17 }
 0x698   :  { %799 = vmatpush.msrb.mxu3 %v56_v19 }
 0x69a   :  { %800 = vmatpush.msrb.mxu3 %v55_v18 }
 0x69c   :  { %801 = vmatpush.msrb.mxu3 %v54_v20 }
 0x6d5   :  { %v762_v22 = vpop.f32.mrf.mxu1 }
 0x6d6   :  { %v763_v23 = vadd.f32 %v1872_v21, %v762_v22 }
 0x6d8   :  { %v770_v24 = vmul.f32 %v763_v23, %v763_v23  ;;  %v768_v30 = vmul.f32 0.5, %v763_v23 }
 0x6da   :  { %v772_v25 = vmul.f32 %v770_v24, %v763_v23 }
 0x6dc   :  { %v774_v26 = vmul.f32 0.044715, %v772_v25 }
 0x6de   :  { %v776_v27 = vadd.f32 %v774_v26, %v763_v23  ;;  %v2407_v23 = vld [vmem:[%s2688_s2 + $0x8] sm:$0x3f] }
 0x6e0   :  { %v778_v28 = vmul.f32 0.7978846, %v776_v27  ;;  %v926_v27 = vperm.slane %v2407_v23, 0 }
 0x6e2   :  { %1924 = vtanh.f32 %v778_v28 }
 0x6e8   :  { %v1925_v29 = vpop.eup %1924 }
 0x6e9   :  { %v782_v31 = vadd.f32 1.0, %v1925_v29 }
 0x6eb   :  { %v784_v32 = vmul.f32 %v782_v31, %v768_v30  ;;  %v929_v30 = vperm.slane %v2407_v23, 1 }
 0x6ed   :  { %802 = vmatmul.f32.vlgmr.msrb.gmra.mxu3 %v784_v32 }
 0x70e   :  { %v765_v33 = vpop.f32.mrf.mxu1 }
 0x70f   :  { %v766_v34 = vadd.f32 %v1872_v21, %v765_v33 }
 0x711   :  { %v771_v35 = vmul.f32 %v766_v34, %v766_v34  ;;  %v769_v41 = vmul.f32 0.5, %v766_v34 }
 0x713   :  { %v773_v36 = vmul.f32 %v771_v35, %v766_v34 }
 0x715   :  { %v775_v37 = vmul.f32 0.044715, %v773_v36 }
 0x717   :  { %v777_v38 = vadd.f32 %v775_v37, %v766_v34 }
 0x719   :  { %v779_v39 = vmul.f32 0.7978846, %v777_v38 }
 0x71b   :  { %1926 = vtanh.f32 %v779_v39 }
 0x721   :  { %v1927_v40 = vpop.eup %1926 }
 0x722   :  { %v783_v42 = vadd.f32 1.0, %v1927_v40 }
 0x724   :  { %v785_v43 = vmul.f32 %v783_v42, %v769_v41 }
 0x726   :  { %805 = vmatmul.f32.gmra.mxu3 %v785_v43 }
 0x770   :  { %v803_v45 = vpop.f32.mrf.mxu3 }
 0x771   :  { %v809_v46 = vadd.f32 %v803_v45, %v2281_v53 }
 0x773   :  { %v2372_v47 = vadd.f32 %v811_v44, %v809_v46 }
 0x775   :  { %v850_v48 = vsel %vm70_vm0, %v2372_v47, 0.0 }
 0x776   :  { %851 = vadd.xlane.f32.xlu1 %v850_v48 }
 0x7a9   :  { %v806_v49 = vpop.f32.mrf.mxu3 }
 0x7aa   :  { %v810_v50 = vadd.f32 %v806_v49, %v2286_v58 }
 0x7ac   :  { %v2377_v51 = vadd.f32 %v811_v44, %v810_v50 }
 0x7ae   :  { %v853_v52 = vsel %vm70_vm0, %v2377_v51, 0.0 }
 0x7af   :  { %854 = vadd.xlane.f32.xlu2 %v853_v52 }
 0x7e9   :  { %v852_v54 = vpop.xlane.xlu1 %851 }
 0x7ea   :  { %v856_v57 = vmul.f32 %v852_v54, %v2102_v10 }
 0x7ec   :  { %v858_v53 = vsub.f32 %v2372_v47, %v856_v57 }
 0x7ee   :  { %v860_v55 = vmul.f32 %v858_v53, %v858_v53 }
 0x7f0   :  { %v862_v56 = vsel %vm70_vm0, %v860_v55, 0.0 }
 0x7f1   :  { %863 = vadd.xlane.f32.xlu1 %v862_v56 }
 0x822   :  { %v855_v59 = vpop.xlane.xlu2 %854 }
 0x823   :  { %v857_v60 = vmul.f32 %v855_v59, %v2102_v10 }
 0x825   :  { %v2386_v58 = vsub.f32 %v2377_v51, %v857_v60 }
 0x827   :  { %v861_v62 = vmul.f32 %v2386_v58, %v2386_v58 }
 0x829   :  { %v865_v2 = vsel %vm70_vm0, %v861_v62, 0.0 }
 0x82a   :  { %866 = vadd.xlane.f32.xlu0 %v865_v2 }
 0x864   :  { %v864_v4 = vpop.xlane.xlu1 %863 }
 0x865   :  { %v868_v5 = vmul.f32 %v864_v4, %v2102_v10 }
 0x867   :  { %v870_v6 = vadd.f32 1e-05, %v868_v5 }
 0x869   :  { %1928 = vrsqrt.f32 %v870_v6  ;;  %vm879_vm2 = vcmp.eq.f32.partialorder %v870_v6, inf  ;;  %v882_v15 = vand.u32 2147483648, %v870_v6  ;;  %vm881_vm3 = vcmp.eq.f32.partialorder %v870_v6, 0.0 }
 0x86f   :  { %v1929_v7 = vpop.eup %1928 }
 0x870   :  { %v873_v8 = vmul.f32 %v1929_v7, %v870_v6 }
 0x872   :  { %v874_v9 = vmul.f32 %v1929_v7, %v873_v8 }
 0x874   :  { %v875_v11 = vmul.f32 0.5, %v874_v9 }
 0x876   :  { %v876_v12 = vsub.f32 1.5, %v875_v11 }
 0x878   :  { %v877_v0 = vmul.f32 %v1929_v7, %v876_v12 }
 0x87a   :  { %v878_v14 = vmul.f32 %v877_v0, %v870_v6 }
 0x87c   :  { %v880_v16 = vsel %vm879_vm2, %v870_v6, %v878_v14 }
 0x87d   :  { %v883_v13 = vsel %vm881_vm3, %v882_v15, %v880_v16 }
 0x87e   :  { %1930 = vrcp.f32 %v883_v13  ;;  %v907_v20 = vand.u32 2147483648, %v883_v13  ;;  %v905_v22 = vand.u32 2147483647, %v883_v13  ;;  %vm901_vm5 = vweird.f32 %v883_v13 }
 0x880   :  { %v908_v25 = vor.u32 1.1754944e-38, %v907_v20  ;;  %vm906_vm7 = vcmp.eq.f32.partialorder %v905_v22, 8.507059e+37  ;;  %v2462_v22 = vld [vmem:[%s2687_s1 + $0x8] sm:$0xff] }
 0x884   :  { %v1931_v17 = vpop.eup %1930 }
 0x885   :  { %v897_v19 = vmul.f32 %v1931_v17, %v883_v13  ;;  %vm902_vm4 = vweird.f32 %v1931_v17 }
 0x886   :  { %vm903_vm6 = vmor %vm901_vm5, %vm902_vm4 }
 0x887   :  { %v898_v18 = vsub.f32 1.0, %v897_v19 }
 0x889   :  { %v899_v21 = vmul.f32 %v1931_v17, %v898_v18 }
 0x88b   :  { %v900_v24 = vadd.f32 %v1931_v17, %v899_v21 }
 0x88d   :  { %v904_v26 = vsel %vm903_vm6, %v1931_v17, %v900_v24  ;;  %v2455_v17 = vld [vmem:[%s2687_s1] sm:$0xff]  ;;  %s2703_s1 = smov 8  }
 0x88e   :  { %v909_v28 = vsel %vm906_vm7, %v908_v25, %v904_v26 }
 0x88f   :  { %v910_v29 = vmul.f32 %v909_v28, %v858_v53 }
 0x891   :  { %v927_v31 = vmul.f32 %v926_v27, %v910_v29 }
 0x893   :  { %v930_v32 = vadd.f32 %v929_v30, %v927_v31 }
 0x895   :  { %1779 = vmatmul.msk.f32.vlgmr.msra.gmra.mxu2 %vm70_vm0, %v930_v32 }
 0x89d   :  { %v867_v33 = vpop.xlane.xlu0 %866 }
 0x89e   :  { %v869_v34 = vmul.f32 %v867_v33, %v2102_v10 }
 0x8a0   :  { %v871_v35 = vadd.f32 1e-05, %v869_v34 }
 0x8a2   :  { %1932 = vrsqrt.f32 %v871_v35  ;;  %vm891_vm8 = vcmp.eq.f32.partialorder %v871_v35, inf  ;;  %v894_v43 = vand.u32 2147483648, %v871_v35  ;;  %vm893_vm9 = vcmp.eq.f32.partialorder %v871_v35, 0.0 }
 0x8a8   :  { %v1933_v36 = vpop.eup %1932 }
 0x8a9   :  { %v885_v37 = vmul.f32 %v1933_v36, %v871_v35 }
 0x8ab   :  { %v886_v38 = vmul.f32 %v1933_v36, %v885_v37 }
 0x8ad   :  { %v887_v39 = vmul.f32 0.5, %v886_v38 }
 0x8af   :  { %v888_v40 = vsub.f32 1.5, %v887_v39 }
 0x8b1   :  { %v889_v41 = vmul.f32 %v1933_v36, %v888_v40 }
 0x8b3   :  { %v890_v42 = vmul.f32 %v889_v41, %v871_v35 }
 0x8b5   :  { %v892_v44 = vsel %vm891_vm8, %v871_v35, %v890_v42 }
 0x8b6   :  { %v895_v45 = vsel %vm893_vm9, %v894_v43, %v892_v44 }
 0x8b7   :  { %1934 = vrcp.f32 %v895_v45  ;;  %v922_v50 = vand.u32 2147483648, %v895_v45  ;;  %v920_v54 = vand.u32 2147483647, %v895_v45  ;;  %vm916_vm11 = vweird.f32 %v895_v45 }
 0x8b9   :  { %v923_v53 = vor.u32 1.1754944e-38, %v922_v50  ;;  %vm921_vm13 = vcmp.eq.f32.partialorder %v920_v54, 8.507059e+37 }
 0x8bd   :  { %v1935_v46 = vpop.eup %1934 }
 0x8be   :  { %v912_v48 = vmul.f32 %v1935_v46, %v895_v45  ;;  %vm917_vm10 = vweird.f32 %v1935_v46 }
 0x8bf   :  { %vm918_vm12 = vmor %vm916_vm11, %vm917_vm10 }
 0x8c0   :  { %v913_v49 = vsub.f32 1.0, %v912_v48 }
 0x8c2   :  { %v914_v52 = vmul.f32 %v1935_v46, %v913_v49 }
 0x8c4   :  { %v915_v57 = vadd.f32 %v1935_v46, %v914_v52 }
 0x8c6   :  { %v919_v55 = vsel %vm918_vm12, %v1935_v46, %v915_v57 }
 0x8c7   :  { %v924_v56 = vsel %vm921_vm13, %v923_v53, %v919_v55 }
 0x8c8   :  { %v925_v59 = vmul.f32 %v924_v56, %v2386_v58 }
 0x8ca   :  { %v928_v60 = vmul.f32 %v926_v27, %v925_v59 }
 0x8cc   :  { %v931_v62 = vadd.f32 %v929_v30, %v928_v60 }
 0x8ce   :  { %1780 = vmatmul.msk.f32.gmra.mxu2 %vm70_vm0, %v931_v62 }
 0x918   :  { %v955_v2 = vpop.f32.mrf.mxu2 }
 0x919   :  { %1163 = vrot.lane.b32.xlu0 %v955_v2, %s2020_s29  ;;  %963 = vrot.lane.b32.xlu1 %v955_v2, %s2017_s26 }
 0x951   :  { %v2417_v63 = vpop.f32.mrf.mxu2 }
 0x952   :  { %965 = vrot.lane.b32.xlu2 %v2417_v63, %s2017_s26  ;;  %v2422_v1 = vpack.i.bf16 %v955_v2, %v2417_v63 }
 0x954   :  { %1853 = vrot.lane.b32.xlu0 %v2422_v1, %s2026_s18 }
 0x95a   :  { %1063 = vrot.lane.b32.xlu2 %v955_v2, %s2019_s28 }
 0x95c   :  { %1165 = vrot.lane.b32.xlu0 %v2417_v63, %s2020_s29  ;;  %s2704_s29 = smov 24  }
 0x962   :  { %1059 = vrot.lane.b32.xlu2 %v955_v2, %s2018_s27 }
 0x96a   :  { %1263 = vrot.lane.b32.xlu2 %v955_v2, %s2021_s30 }
 0x972   :  { %1065 = vrot.lane.b32.xlu2 %v2417_v63, %s2019_s28 }
 0x97a   :  { %1061 = vrot.lane.b32.xlu2 %v2417_v63, %s2018_s27 }
 0x982   :  { %1265 = vrot.lane.b32.xlu2 %v2417_v63, %s2021_s30  ;;  %s2705_s30 = smov 16  }
 0x98a   :  { %1259 = vrot.lane.b32.xlu2 %v955_v2, %s2023_s12 }
 0x98b   :  { %v964_v3 = vpop.permute.xlu1 %963  ;;  %v1164_v5 = vpop.permute.xlu0 %1163 }
 0x9ac   :  { %v966_v58 = vpop.permute.xlu2 %965 }
 0x9ad   :  { %1781 = vmatpush.xpose.msk.msrb.mxu0 %vm195_vm14, %v966_v58 }
 0x9b1   :  { %1782 = vmatpush.xpose.msk.msrb.mxu0 %vm195_vm14, %v964_v3 }
 0x9b4   :  { %1783 = vmatmul.msk.f32.vlgmr.msrb.gmra.mxu0 %vm195_vm14, %v955_v2  ;;  %v1064_v61 = vpop.permute.xlu2 %1063 }
 0x9bc   :  { %1784 = vmatmul.msk.f32.gmra.mxu0 %vm195_vm14, %v2417_v63  ;;  %v1060_v4 = vpop.permute.xlu2 %1059 }
 0x9c4   :  { %v1264_v6 = vpop.permute.xlu2 %1263 }
 0x9c6   :  { %v1854_v7 = vpop.permute.xlu0 %1853 }
 0x9c7   :  { %v1855_v8 = vunpack.i.l.bf16 %v1854_v7  ;;  %v1856_v9 = vunpack.i.h.bf16 %v1854_v7 }
 0x9c9   :  { %1050 = vmatpush.msra.mxu1 %v1855_v8 }
 0x9cb   :  { %1051 = vmatpush.msra.mxu1 %v1856_v9 }
 0x9cc   :  { %v1066_v11 = vpop.permute.xlu2 %1065 }
 0x9cd   :  { %1787 = vmatpush.xpose.msk.msrb.mxu2 %vm195_vm14, %v1066_v11 }
 0x9ce   :  { %v1166_v12 = vpop.permute.xlu0 %1165 }
 0x9cf   :  { %1793 = vmatpush.xpose.msk.msrb.mxu1 %vm195_vm14, %v1166_v12 }
 0x9d1   :  { %1788 = vmatpush.xpose.msk.msrb.mxu2 %vm195_vm14, %v1064_v61 }
 0x9d3   :  { %1794 = vmatpush.xpose.msk.msrb.mxu1 %vm195_vm14, %v1164_v5 }
 0x9d4   :  { %1789 = vmatmul.msk.f32.vlgmr.msrb.gmra.mxu2 %vm195_vm14, %v1060_v4  ;;  %v1062_v0 = vpop.permute.xlu2 %1061 }
 0x9dc   :  { %1790 = vmatmul.msk.f32.gmra.mxu2 %vm195_vm14, %v1062_v0  ;;  %v1266_v14 = vpop.permute.xlu2 %1265 }
 0x9dd   :  { %1799 = vmatpush.xpose.msk.msra.mxu2 %vm195_vm14, %v1266_v14 }
 0x9e1   :  { %1800 = vmatpush.xpose.msk.msra.mxu2 %vm195_vm14, %v1264_v6 }
 0x9e4   :  { %v1260_v15 = vpop.permute.xlu2 %1259 }
 0x9e5   :  { %1801 = vmatmul.msk.f32.vlgmr.msra.gmra.mxu2 %vm195_vm14, %v1260_v15 }
 0xa31   :  { %v992_v16 = vpop.f32.mrf.mxu0 }
 0xa32   :  { %v998_v13 = vmul.f32 0.35355338, %v992_v16 }
 0xa34   :  { %v1000_v19 = vadd.f32 %v2455_v17, %v998_v13 }
 0xa36   :  { %v1002_v18 = vsel %vm231_vm15, %v1000_v19, -inf }
 0xa37   :  { %1003 = vmax.xlane.f32.xlu0 %v1002_v18 }
 0xa39   :  { %v995_v20 = vpop.f32.mrf.mxu0 }
 0xa3a   :  { %v999_v21 = vmul.f32 0.35355338, %v995_v20 }
 0xa3c   :  { %v1001_v24 = vadd.f32 %v2462_v22, %v999_v21 }
 0xa3e   :  { %v1005_v25 = vsel %vm231_vm15, %v1001_v24, -inf }
 0xa3f   :  { %1006 = vmax.xlane.f32.xlu0 %v1005_v25 }
 0xa53   :  { %1159 = vrot.lane.b32.xlu0 %v955_v2, %s2022_s11 }
 0xa57   :  { %v1092_v26 = vpop.f32.mrf.mxu2 }
 0xa58   :  { %v1098_v27 = vmul.f32 0.35355338, %v1092_v26 }
 0xa5a   :  { %v2468_v28 = vadd.f32 %v2455_v17, %v1098_v27 }
 0xa5c   :  { %v1102_v29 = vsel %vm231_vm15, %v2468_v28, -inf }
 0xa5d   :  { %1103 = vmax.xlane.f32.xlu2 %v1102_v29 }
 0xa5f   :  { %v1095_v30 = vpop.f32.mrf.mxu2 }
 0xa60   :  { %v1099_v45 = vmul.f32 0.35355338, %v1095_v30 }
 0xa62   :  { %v1101_v46 = vadd.f32 %v2462_v22, %v1099_v45 }
 0xa64   :  { %v1105_v48 = vsel %vm231_vm15, %v1101_v46, -inf }
 0xa68   :  { %v1292_v31 = vpop.f32.mrf.mxu2 }
 0xa69   :  { %v1298_v32 = vmul.f32 0.35355338, %v1292_v31 }
 0xa6b   :  { %v2473_v33 = vadd.f32 %v2455_v17, %v1298_v32 }
 0xa6d   :  { %v1302_v34 = vsel %vm231_vm15, %v2473_v33, -inf }
 0xa6e   :  { %1303 = vmax.xlane.f32.xlu2 %v1302_v34 }
 0xaaa   :  { %v1004_v35 = vpop.xlane.xlu0 %1003 }
 0xaab   :  { %v1008_v36 = vsub.f32 %v1000_v19, %v1004_v35 }
 0xaad   :  { %v1010_v37 = vmul.f32 1.442695, %v1008_v36 }
 0xaaf   :  { %1936 = vpow2.f32 %v1010_v37 }
 0xab2   :  { %v1007_v38 = vpop.xlane.xlu0 %1006 }
 0xab3   :  { %v1009_v39 = vsub.f32 %v1001_v24, %v1007_v38 }
 0xab5   :  { %v1937_v40 = vpop.eup %1936  ;;  %v1012_v41 = vmul.f32 1.442695, %v1009_v39 }
 0xab6   :  { %v1014_v42 = vsel %vm231_vm15, %v1937_v40, 0.0 }
 0xab7   :  { %1938 = vpow2.f32 %v1012_v41  ;;  %1015 = vadd.xlane.f32.xlu0 %v1014_v42 }
 0xabd   :  { %v1939_v43 = vpop.eup %1938 }
 0xabe   :  { %v1017_v44 = vsel %vm231_vm15, %v1939_v43, 0.0 }
 0xabf   :  { %1018 = vadd.xlane.f32.xlu1 %v1017_v44 }
 0xac5   :  { %v1160_v49 = vpop.permute.xlu0 %1159 }
 0xacb   :  { %1261 = vrot.lane.b32.xlu0 %v2417_v63, %s2023_s12 }
 0xad0   :  { %v1104_v4 = vpop.xlane.xlu2 %1103 }
 0xad1   :  { %v1108_v9 = vsub.f32 %v2468_v28, %v1104_v4 }
 0xad3   :  { %v1110_v0 = vmul.f32 1.442695, %v1108_v9 }
 0xad8   :  { %1161 = vrot.lane.b32.xlu1 %v2417_v63, %s2022_s11 }
 0xae1   :  { %v1304_v15 = vpop.xlane.xlu2 %1303 }
 0xaf5   :  { %1106 = vmax.xlane.f32.xlu0 %v1105_v48 }
 0xb2a   :  { %v1016_v50 = vpop.xlane.xlu0 %1015 }
 0xb2b   :  { %1940 = vrcp.f32 %v1016_v50 }
 0xb31   :  { %v1941_v52 = vpop.eup %1940 }
 0xb32   :  { %v1022_v54 = vmul.f32 %v1941_v52, %v1937_v40  ;;  %v1019_v57 = vpop.xlane.xlu1 %1018 }
 0xb33   :  { %1942 = vrcp.f32 %v1019_v57 }
 0xb34   :  { %1785 = vmatmul.msk.f32.vlgmr.msra.gmra.mxu1 %vm231_vm15, %v1022_v54 }
 0xb39   :  { %v1943_v53 = vpop.eup %1942 }
 0xb3a   :  { %v1023_v55 = vmul.f32 %v1943_v53, %v1939_v43 }
 0xb3c   :  { %1786 = vmatmul.msk.f32.gmra.mxu1 %vm231_vm15, %v1023_v55 }
 0xb3d   :  { %v1262_v56 = vpop.permute.xlu0 %1261 }
 0xb3e   :  { %1802 = vmatmul.msk.f32.gmra.mxu2 %vm195_vm14, %v1262_v56 }
 0xb44   :  { %1795 = vmatmul.msk.f32.vlgmr.msrb.gmra.mxu1 %vm195_vm14, %v1160_v49 }
 0xb4a   :  { %v1162_v59 = vpop.permute.xlu1 %1161 }
 0xb4c   :  { %1796 = vmatmul.msk.f32.gmra.mxu1 %vm195_vm14, %v1162_v59 }
 0xb68   :  { %v1107_v2 = vpop.xlane.xlu0 %1106 }
 0xb69   :  { %v1109_v63 = vsub.f32 %v1101_v46, %v1107_v2 }
 0xb6b   :  { %v1112_v58 = vmul.f32 1.442695, %v1109_v63 }
 0xb6d   :  { %1944 = vpow2.f32 %v1112_v58 }
 0xb6e   :  { %1946 = vpow2.f32 %v1110_v0 }
 0xb73   :  { %v1945_v13 = vpop.eup %1944 }
 0xb74   :  { %v1117_v20 = vsel %vm231_vm15, %v1945_v13, 0.0  ;;  %v1947_v24 = vpop.eup %1946 }
 0xb75   :  { %v1114_v25 = vsel %vm231_vm15, %v1947_v24, 0.0 }
 0xbb1   :  { %v2490_v60 = vpop.f32.mrf.mxu1 }
 0xbb9   :  { %v2492_v62 = vpop.f32.mrf.mxu1 }
 0xbc1   :  { %v1192_v3 = vpop.f32.mrf.mxu1  ;;  %v1295_v61 = vpop.f32.mrf.mxu2 }
 0xbc2   :  { %v1198_v5 = vmul.f32 0.35355338, %v1192_v3  ;;  %v1299_v6 = vmul.f32 0.35355338, %v1295_v61 }
 0xbc4   :  { %v1200_v7 = vadd.f32 %v2455_v17, %v1198_v5  ;;  %v1301_v8 = vadd.f32 %v2462_v22, %v1299_v6  ;;  %v1308_v17 = vsub.f32 %v2473_v33, %v1304_v15 }
 0xbc6   :  { %v1202_v11 = vsel %vm231_vm15, %v1200_v7, -inf  ;;  %v1305_v12 = vsel %vm231_vm15, %v1301_v8, -inf  ;;  %v1310_v21 = vmul.f32 1.442695, %v1308_v17  ;;  %v1755_v17 = vld [vmem:[%s2690_s4 + $0x28] sm:$0xff] }
 0xbc7   :  { %1203 = vmax.xlane.f32.xlu1 %v1202_v11  ;;  %1306 = vmax.xlane.f32.xlu2 %v1305_v12 }
 0xbc8   :  { %1948 = vpow2.f32 %v1310_v21 }
 0xbc9   :  { %v1195_v14 = vpop.f32.mrf.mxu1 }
 0xbca   :  { %v1199_v16 = vmul.f32 0.35355338, %v1195_v14 }
 0xbcc   :  { %v1201_v19 = vadd.f32 %v2462_v22, %v1199_v16 }
 0xbce   :  { %v1205_v18 = vsel %vm231_vm15, %v1201_v19, -inf  ;;  %v1949_v26 = vpop.eup %1948 }
 0xbcf   :  { %1206 = vmax.xlane.f32.xlu0 %v1205_v18  ;;  %1118 = vadd.xlane.f32.xlu1 %v1117_v20  ;;  %v1314_v27 = vsel %vm231_vm15, %v1949_v26, 0.0  ;;  %v1754_v18 = vld [vmem:[%s2690_s4 + $0x20] sm:$0xff] }
 0xbd7   :  { %1115 = vadd.xlane.f32.xlu0 %v1114_v25 }
 0xbdf   :  { %1858 = vrot.lane.b32.xlu2 %v2422_v1, %s2025_s17  ;;  %1315 = vadd.xlane.f32.xlu0 %v1314_v27 }
 0xbe7   :  { %1868 = vrot.lane.b32.xlu2 %v2422_v1, %s2024_s0 }
 0xbe8   :  { %1863 = vrot.lane.b32.xlu1 %v2422_v1, %s2027_s19 }
 0xc3a   :  { %v1204_v22 = vpop.xlane.xlu1 %1203  ;;  %v1307_v28 = vpop.xlane.xlu2 %1306 }
 0xc3b   :  { %v1208_v29 = vsub.f32 %v1200_v7, %v1204_v22  ;;  %v1309_v36 = vsub.f32 %v1301_v8, %v1307_v28 }
 0xc3d   :  { %v1210_v30 = vmul.f32 1.442695, %v1208_v29  ;;  %v1312_v1 = vmul.f32 1.442695, %v1309_v36 }
 0xc3f   :  { %1950 = vpow2.f32 %v1210_v30 }
 0xc42   :  { %v1207_v31 = vpop.xlane.xlu0 %1206  ;;  %v1859_v33 = vpop.permute.xlu2 %1858 }
 0xc43   :  { %v1209_v32 = vsub.f32 %v1201_v19, %v1207_v31  ;;  %v1860_v34 = vunpack.i.l.bf16 %v1859_v33  ;;  %v1861_v38 = vunpack.i.h.bf16 %v1859_v33  ;;  %v1119_v44 = vpop.xlane.xlu1 %1118  ;;  %v1756_v19 = vld [vmem:[%s2690_s4 + $0x30] sm:$0xff] }
 0xc45   :  { %v1951_v35 = vpop.eup %1950  ;;  %v1212_v37 = vmul.f32 1.442695, %v1209_v32  ;;  %1150 = vmatpush.msra.mxu0 %v1860_v34 }
 0xc46   :  { %v1214_v39 = vsel %vm231_vm15, %v1951_v35, 0.0 }
 0xc47   :  { %1952 = vpow2.f32 %v1212_v37  ;;  %1215 = vadd.xlane.f32.xlu0 %v1214_v39  ;;  %1151 = vmatpush.msra.mxu0 %v1861_v38 }
 0xc4a   :  { %v1116_v40 = vpop.xlane.xlu0 %1115  ;;  %v1869_v41 = vpop.permute.xlu2 %1868 }
 0xc4b   :  { %1954 = vrcp.f32 %v1116_v40  ;;  %v1870_v42 = vunpack.i.l.bf16 %v1869_v41  ;;  %v1871_v45 = vunpack.i.h.bf16 %v1869_v41 }
 0xc4c   :  { %1956 = vpow2.f32 %v1312_v1 }
 0xc4d   :  { %v1953_v43 = vpop.eup %1952  ;;  %1350 = vmatpush.msrb.mxu0 %v1870_v42  ;;  %1958 = vrcp.f32 %v1119_v44 }
 0xc4e   :  { %v1217_v46 = vsel %vm231_vm15, %v1953_v43, 0.0 }
 0xc4f   :  { %1218 = vadd.xlane.f32.xlu0 %v1217_v46  ;;  %1351 = vmatpush.msrb.mxu0 %v1871_v45 }
 0xc51   :  { %v1955_v48 = vpop.eup %1954 }
 0xc52   :  { %v1122_v49 = vmul.f32 %v1955_v48, %v1947_v24  ;;  %v1957_v50 = vpop.eup %1956  ;;  %v1316_v52 = vpop.xlane.xlu0 %1315  ;;  %v1761_v48 = vld [vmem:[%s2691_s5 + $0x38] sm:$0xff] }
 0xc53   :  { %v1317_v54 = vsel %vm231_vm15, %v1957_v50, 0.0  ;;  %v1959_v57 = vpop.eup %1958  ;;  %1960 = vrcp.f32 %v1316_v52  ;;  %v1758_v52 = vld [vmem:[%s2691_s5 + $0x20] sm:$0xff] }
 0xc54   :  { %1791 = vmatmul.msk.f32.vlgmr.msra.gmra.mxu0 %vm231_vm15, %v1122_v49  ;;  %v1123_v55 = vmul.f32 %v1959_v57, %v1945_v13  ;;  %v1757_v13 = vld [vmem:[%s2690_s4 + $0x38] sm:$0xff]  ;;  %v1760_v49 = vld [vmem:[%s2691_s5 + $0x30] sm:$0xff] }
 0xc55   :  { %1407 = vmatpush.msra.mxu1 %v1757_v13  ;;  %v1776_v13 = vld [vmem:[%s2693_s7 + $0xe8] sm:$0xff] }
 0xc57   :  { %1318 = vadd.xlane.f32.xlu0 %v1317_v54  ;;  %1408 = vmatpush.msra.mxu1 %v1756_v19 }
 0xc59   :  { %v1961_v2 = vpop.eup %1960  ;;  %1409 = vmatpush.msra.mxu1 %v1755_v17  ;;  %v1775_v17 = vld [vmem:[%s2693_s7 + $0xe0] sm:$0xff] }
 0xc5a   :  { %v1864_v53 = vpop.permute.xlu1 %1863  ;;  %v1322_v63 = vmul.f32 %v1961_v2, %v1949_v26 }
 0xc5b   :  { %v1865_v56 = vunpack.i.l.bf16 %v1864_v53  ;;  %v1866_v59 = vunpack.i.h.bf16 %v1864_v53  ;;  %1410 = vmatpush.msra.mxu1 %v1754_v18 }
 0xc5c   :  { %1792 = vmatmul.msk.f32.gmra.mxu0 %vm231_vm15, %v1123_v55 }
 0xc5d   :  { %1250 = vmatpush.msra.mxu3 %v1865_v56 }
 0xc5f   :  { %1251 = vmatpush.msra.mxu3 %v1866_v59 }
 0xc61   :  { %1526 = vmatpush.msrb.mxu3 %v1761_v48 }
 0xc63   :  { %1527 = vmatpush.msrb.mxu3 %v1760_v49 }
 0xc64   :  { %1803 = vmatmul.msk.f32.vlgmr.msrb.gmra.mxu0 %vm231_vm15, %v1322_v63 }
 0xcba   :  { %v1216_v58 = vpop.xlane.xlu0 %1215 }
 0xcbb   :  { %1962 = vrcp.f32 %v1216_v58 }
 0xcc1   :  { %v1963_v3 = vpop.eup %1962 }
 0xcc2   :  { %v1222_v61 = vmul.f32 %v1963_v3, %v1951_v35  ;;  %v1219_v4 = vpop.xlane.xlu0 %1218 }
 0xcc3   :  { %1964 = vrcp.f32 %v1219_v4 }
 0xcc4   :  { %1797 = vmatmul.msk.f32.vlgmr.msra.gmra.mxu3 %vm231_vm15, %v1222_v61 }
 0xcc9   :  { %v1965_v5 = vpop.eup %1964 }
 0xcca   :  { %v1319_v6 = vpop.xlane.xlu0 %1318  ;;  %v1223_v7 = vmul.f32 %v1965_v5, %v1953_v43 }
 0xccb   :  { %1966 = vrcp.f32 %v1319_v6 }
 0xccc   :  { %1798 = vmatmul.msk.f32.gmra.mxu3 %vm231_vm15, %v1223_v7 }
 0xcd1   :  { %v1967_v8 = vpop.eup %1966  ;;  %v1153_v9 = vpop.f32.mrf.mxu0 }
 0xcd2   :  { %1361 = vrot.lane.b32.xlu2 %v1153_v9, %s2703_s1  ;;  %v1323_v11 = vmul.f32 %v1967_v8, %v1957_v50  ;;  %v1759_v50 = vld [vmem:[%s2691_s5 + $0x28] sm:$0xff] }
 0xcd3   :  { %1528 = vmatpush.msrb.mxu3 %v1759_v50 }
 0xcd4   :  { %1804 = vmatmul.msk.f32.gmra.mxu0 %vm231_vm15, %v1323_v11 }
 0xcd5   :  { %1529 = vmatpush.msrb.mxu3 %v1758_v52  ;;  %v1774_v52 = vld [vmem:[%s2693_s7 + $0xd8] sm:$0xff] }
 0xcd9   :  { %v1156_v12 = vpop.f32.mrf.mxu0 }
 0xcda   :  { %1363 = vrot.lane.b32.xlu2 %v1156_v12, %s2703_s1 }
 0xce1   :  { %v1353_v0 = vpop.f32.mrf.mxu0 }
 0xce2   :  { %1377 = vrot.lane.b32.xlu1 %v1353_v0, %s2704_s29 }
 0xd2c   :  { %v1362_v20 = vpop.permute.xlu2 %1361 }
 0xd2d   :  { %v1383_v21 = vsel %vm195_vm14, %v2490_v60, %v1362_v20  ;;  %v1420_v60 = vperm.slane %v2407_v23, 4 }
 0xd34   :  { %v1364_v26 = vpop.permute.xlu2 %1363 }
 0xd35   :  { %v1384_v28 = vsel %vm195_vm14, %v2492_v62, %v1364_v26 }
 0xd47   :  { %v1253_v14 = vpop.f32.mrf.mxu3 }
 0xd48   :  { %1369 = vrot.lane.b32.xlu0 %v1253_v14, %s2705_s30  ;;  %v1778_v14 = vld [vmem:[%s2693_s7 + $0xf8] sm:$0xff] }
 0xd49   :  { %1555 = vmatpush.msrb.mxu2 %v1778_v14 }
 0xd4f   :  { %v1256_v15 = vpop.f32.mrf.mxu3 }
 0xd50   :  { %1371 = vrot.lane.b32.xlu1 %v1256_v15, %s2705_s30  ;;  %v1777_v15 = vld [vmem:[%s2693_s7 + $0xf0] sm:$0xff] }
 0xd51   :  { %v1356_v16 = vpop.f32.mrf.mxu0  ;;  %1556 = vmatpush.msrb.mxu2 %v1777_v15 }
 0xd52   :  { %1379 = vrot.lane.b32.xlu2 %v1356_v16, %s2704_s29 }
 0xd53   :  { %1557 = vmatpush.msrb.mxu2 %v1776_v13 }
 0xd54   :  { %v1378_v24 = vpop.permute.xlu1 %1377 }
 0xd55   :  { %1558 = vmatpush.msrb.mxu2 %v1775_v17 }
 0xd57   :  { %1559 = vmatpush.msrb.mxu2 %v1774_v52 }
 0xdac   :  { %v1380_v30 = vpop.permute.xlu2 %1379 }
 0xdba   :  { %v1370_v25 = vpop.permute.xlu0 %1369 }
 0xdbb   :  { %v1385_v27 = vsel %vm231_vm15, %v1383_v21, %v1370_v25 }
 0xdbc   :  { %v1387_v22 = vsel %vm617_vm1, %v1385_v27, %v1378_v24 }
 0xdbd   :  { %1805 = vmatmul.msk.f32.vlgmr.msra.gmra.mxu1 %vm70_vm0, %v1387_v22 }
 0xdc2   :  { %v1372_v29 = vpop.permute.xlu1 %1371 }
 0xdc3   :  { %v1386_v31 = vsel %vm231_vm15, %v1384_v28, %v1372_v29 }
 0xdc4   :  { %v1388_v32 = vsel %vm617_vm1, %v1386_v31, %v1380_v30 }
 0xdc5   :  { %1806 = vmatmul.msk.f32.gmra.mxu1 %vm70_vm0, %v1388_v32 }
 0xe3a   :  { %v1412_v33 = vpop.f32.mrf.mxu1 }
 0xe3b   :  { %v1418_v34 = vadd.f32 %v1412_v33, %v2372_v47  ;;  %v1499_v33 = vperm.slane %v2407_v23, 2 }
 0xe3d   :  { %v2550_v35 = vadd.f32 %v1420_v60, %v1418_v34 }
 0xe3f   :  { %v1423_v36 = vsel %vm70_vm0, %v2550_v35, 0.0 }
 0xe40   :  { %1424 = vadd.xlane.f32.xlu1 %v1423_v36 }
 0xe42   :  { %v1415_v62 = vpop.f32.mrf.mxu1 }
 0xe43   :  { %v1419_v37 = vadd.f32 %v1415_v62, %v2377_v51 }
 0xe45   :  { %v2555_v38 = vadd.f32 %v1420_v60, %v1419_v37  ;;  %v1502_v37 = vperm.slane %v2407_v23, 3 }
 0xe47   :  { %v1426_v39 = vsel %vm70_vm0, %v2555_v38, 0.0 }
 0xe48   :  { %1427 = vadd.xlane.f32.xlu0 %v1426_v39 }
 0xeb3   :  { %v1425_v1 = vpop.xlane.xlu1 %1424 }
 0xeb4   :  { %v1429_v40 = vmul.f32 %v1425_v1, %v2102_v10 }
 0xeb6   :  { %v2561_v47 = vsub.f32 %v2550_v35, %v1429_v40 }
 0xeb8   :  { %v1433_v41 = vmul.f32 %v2561_v47, %v2561_v47 }
 0xeba   :  { %v1435_v42 = vsel %vm70_vm0, %v1433_v41, 0.0 }
 0xebb   :  { %1436 = vadd.xlane.f32.xlu2 %v1435_v42  ;;  %v1428_v43 = vpop.xlane.xlu0 %1427 }
 0xebc   :  { %v1430_v51 = vmul.f32 %v1428_v43, %v2102_v10 }
 0xebe   :  { %v2568_v44 = vsub.f32 %v2555_v38, %v1430_v51 }
 0xec0   :  { %v1434_v45 = vmul.f32 %v2568_v44, %v2568_v44 }
 0xec2   :  { %v1438_v46 = vsel %vm70_vm0, %v1434_v45, 0.0 }
 0xec3   :  { %1439 = vadd.xlane.f32.xlu1 %v1438_v46 }
 0xf2e   :  { %v1437_v54 = vpop.xlane.xlu2 %1436 }
 0xf2f   :  { %v1441_v57 = vmul.f32 %v1437_v54, %v2102_v10  ;;  %v1773_v54 = vld [vmem:[%s2693_s7 + $0xd0] sm:$0xff] }
 0xf30   :  { %1560 = vmatpush.msrb.mxu2 %v1773_v54 }
 0xf31   :  { %v1443_v53 = vadd.f32 1e-05, %v1441_v57  ;;  %v1772_v57 = vld [vmem:[%s2693_s7 + $0xc8] sm:$0xff] }
 0xf32   :  { %1561 = vmatpush.msrb.mxu2 %v1772_v57 }
 0xf33   :  { %1968 = vrsqrt.f32 %v1443_v53  ;;  %vm1452_vm14 = vcmp.eq.f32.partialorder %v1443_v53, inf  ;;  %v1455_v9 = vand.u32 2147483648, %v1443_v53  ;;  %vm1454_vm15 = vcmp.eq.f32.partialorder %v1443_v53, 0.0 }
 0xf36   :  { %v1440_v55 = vpop.xlane.xlu1 %1439 }
 0xf37   :  { %v1442_v56 = vmul.f32 %v1440_v55, %v2102_v10  ;;  %v1769_v55 = vld [vmem:[%s2693_s7 + $0xb0] sm:$0xff] }
 0xf39   :  { %v1969_v59 = vpop.eup %1968  ;;  %v1444_v2 = vadd.f32 1e-05, %v1442_v56  ;;  %v1768_v56 = vld [vmem:[%s2693_s7 + $0xa8] sm:$0xff] }
 0xf3a   :  { %v1446_v63 = vmul.f32 %v1969_v59, %v1443_v53 }
 0xf3b   :  { %1970 = vrsqrt.f32 %v1444_v2  ;;  %vm1464_vm1 = vcmp.eq.f32.partialorder %v1444_v2, inf  ;;  %v1467_v20 = vand.u32 2147483648, %v1444_v2  ;;  %vm1466_vm2 = vcmp.eq.f32.partialorder %v1444_v2, 0.0 }
 0xf3c   :  { %v1447_v58 = vmul.f32 %v1969_v59, %v1446_v63  ;;  %v1765_v63 = vld [vmem:[%s2693_s7 + $0x90] sm:$0xff] }
 0xf3e   :  { %v1448_v3 = vmul.f32 0.5, %v1447_v58  ;;  %v1764_v58 = vld [vmem:[%s2693_s7 + $0x88] sm:$0xff] }
 0xf40   :  { %v1449_v61 = vsub.f32 1.5, %v1448_v3  ;;  %v1763_v3 = vld [vmem:[%s2693_s7 + $0x80] sm:$0xff] }
 0xf41   :  { %v1971_v4 = vpop.eup %1970 }
 0xf42   :  { %v1450_v5 = vmul.f32 %v1969_v59, %v1449_v61  ;;  %v1458_v6 = vmul.f32 %v1971_v4, %v1444_v2  ;;  %v1767_v59 = vld [vmem:[%s2693_s7 + $0xa0] sm:$0xff] }
 0xf43   :  { %v1873_v61 = vld [vmem:[%s2692_s6 + $0x1] ss:$0 sm:$0xff] }
 0xf44   :  { %v1451_v7 = vmul.f32 %v1450_v5, %v1443_v53  ;;  %v1459_v8 = vmul.f32 %v1971_v4, %v1458_v6 }
 0xf46   :  { %v1453_v11 = vsel %vm1452_vm14, %v1443_v53, %v1451_v7  ;;  %v1460_v12 = vmul.f32 0.5, %v1459_v8  ;;  %v1770_v53 = vld [vmem:[%s2693_s7 + $0xb8] sm:$0xff] }
 0xf47   :  { %v1456_v0 = vsel %vm1454_vm15, %v1455_v9, %v1453_v11 }
 0xf48   :  { %v1461_v16 = vsub.f32 1.5, %v1460_v12  ;;  %1972 = vrcp.f32 %v1456_v0  ;;  %v1480_v22 = vand.u32 2147483648, %v1456_v0  ;;  %v1478_v29 = vand.u32 2147483647, %v1456_v0 }
 0xf49   :  { %vm1474_vm4 = vweird.f32 %v1456_v0 }
 0xf4a   :  { %v1462_v19 = vmul.f32 %v1971_v4, %v1461_v16  ;;  %v1481_v32 = vor.u32 1.1754944e-38, %v1480_v22  ;;  %vm1479_vm6 = vcmp.eq.f32.partialorder %v1478_v29, 8.507059e+37  ;;  %v1580_v22 = vperm.slane %v2407_v23, 5 }
 0xf4c   :  { %v1463_v18 = vmul.f32 %v1462_v19, %v1444_v2 }
 0xf4e   :  { %v1973_v21 = vpop.eup %1972  ;;  %v1465_v24 = vsel %vm1464_vm1, %v1444_v2, %v1463_v18  ;;  %v1766_v2 = vld [vmem:[%s2693_s7 + $0x98] sm:$0xff] }
 0xf4f   :  { %v1470_v25 = vmul.f32 %v1973_v21, %v1456_v0  ;;  %v1468_v26 = vsel %vm1466_vm2, %v1467_v20, %v1465_v24  ;;  %vm1475_vm3 = vweird.f32 %v1973_v21 }
 0xf50   :  { %1974 = vrcp.f32 %v1468_v26  ;;  %vm1476_vm5 = vmor %vm1474_vm4, %vm1475_vm3  ;;  %v1495_v1 = vand.u32 2147483648, %v1468_v26  ;;  %v1493_v42 = vand.u32 2147483647, %v1468_v26  ;;  %vm1489_vm8 = vweird.f32 %v1468_v26 }
 0xf51   :  { %v1471_v27 = vsub.f32 1.0, %v1470_v25 }
 0xf52   :  { %v1496_v45 = vor.u32 1.1754944e-38, %v1495_v1  ;;  %vm1494_vm10 = vcmp.eq.f32.partialorder %v1493_v42, 8.507059e+37  ;;  %v1669_v42 = vld [vmem:[%s2695_s9 + $0x18] sm:$0xff] }
 0xf53   :  { %v1472_v28 = vmul.f32 %v1973_v21, %v1471_v27  ;;  %1688 = vmatpush.msra.mxu0 %v1669_v42 }
 0xf55   :  { %v1473_v30 = vadd.f32 %v1973_v21, %v1472_v28 }
 0xf56   :  { %v1975_v31 = vpop.eup %1974 }
 0xf57   :  { %v1477_v60 = vsel %vm1476_vm5, %v1973_v21, %v1473_v30  ;;  %v1485_v34 = vmul.f32 %v1975_v31, %v1468_v26  ;;  %vm1490_vm7 = vweird.f32 %v1975_v31 }
 0xf58   :  { %v1482_v36 = vsel %vm1479_vm6, %v1481_v32, %v1477_v60  ;;  %vm1491_vm9 = vmor %vm1489_vm8, %vm1490_vm7 }
 0xf59   :  { %v1483_v62 = vmul.f32 %v1482_v36, %v2561_v47  ;;  %v1486_v39 = vsub.f32 1.0, %v1485_v34 }
 0xf5b   :  { %v1500_v40 = vmul.f32 %v1499_v33, %v1483_v62  ;;  %v1487_v41 = vmul.f32 %v1975_v31, %v1486_v39 }
 0xf5d   :  { %v1503_v43 = vadd.f32 %v1502_v37, %v1500_v40  ;;  %v1488_v51 = vadd.f32 %v1975_v31, %v1487_v41 }
 0xf5f   :  { %1807 = vmatmul.msk.f32.vlgmr.msrb.gmra.mxu3 %vm70_vm0, %v1503_v43  ;;  %v1492_v46 = vsel %vm1491_vm9, %v1975_v31, %v1488_v51  ;;  %v1668_v43 = vld [vmem:[%s2695_s9 + $0x10] sm:$0xff]  ;;  %v1667_v51 = vld [vmem:[%s2695_s9 + $0x8] sm:$0xff] }
 0xf60   :  { %v1497_v48 = vsel %vm1494_vm10, %v1496_v45, %v1492_v46  ;;  %1689 = vmatpush.msra.mxu0 %v1668_v43  ;;  %v1666_v45 = vld [vmem:[%s2695_s9] sm:$0xff] }
 0xf61   :  { %v1498_v47 = vmul.f32 %v1497_v48, %v2568_v44  ;;  %v1771_v44 = vld [vmem:[%s2693_s7 + $0xc0] sm:$0xff] }
 0xf62   :  { %1562 = vmatpush.msrb.mxu2 %v1771_v44  ;;  %1690 = vmatpush.msra.mxu0 %v1667_v51 }
 0xf63   :  { %v1501_v49 = vmul.f32 %v1499_v33, %v1498_v47 }
 0xf64   :  { %1563 = vmatpush.msrb.mxu2 %v1770_v53  ;;  %1691 = vmatpush.msra.mxu0 %v1666_v45 }
 0xf65   :  { %v1504_v50 = vadd.f32 %v1502_v37, %v1501_v49 }
 0xf66   :  { %1564 = vmatpush.msrb.mxu2 %v1769_v55 }
 0xf67   :  { %1808 = vmatmul.msk.f32.gmra.mxu3 %vm70_vm0, %v1504_v50 }
 0xf68   :  { %1565 = vmatpush.msrb.mxu2 %v1768_v56 }
 0xf6a   :  { %1566 = vmatpush.msrb.mxu2 %v1767_v59 }
 0xf6c   :  { %1567 = vmatpush.msrb.mxu2 %v1766_v2 }
 0xf6e   :  { %1568 = vmatpush.msrb.mxu2 %v1765_v63 }
 0xf70   :  { %1569 = vmatpush.msrb.mxu2 %v1764_v58 }
 0xf72   :  { %1570 = vmatpush.msrb.mxu2 %v1763_v3 }
 0xfe2   :  { %v1531_v4 = vpop.f32.mrf.mxu3 }
 0xfe3   :  { %v1532_v5 = vadd.f32 %v1873_v61, %v1531_v4 }
 0xfe5   :  { %v1539_v6 = vmul.f32 %v1532_v5, %v1532_v5  ;;  %v1537_v18 = vmul.f32 0.5, %v1532_v5 }
 0xfe7   :  { %v1541_v7 = vmul.f32 %v1539_v6, %v1532_v5 }
 0xfe9   :  { %v1543_v8 = vmul.f32 0.044715, %v1541_v7 }
 0xfea   :  { %v1534_v9 = vpop.f32.mrf.mxu3 }
 0xfeb   :  { %v1545_v11 = vadd.f32 %v1543_v8, %v1532_v5  ;;  %v1535_v12 = vadd.f32 %v1873_v61, %v1534_v9 }
 0xfed   :  { %v1547_v0 = vmul.f32 0.7978846, %v1545_v11  ;;  %v1540_v14 = vmul.f32 %v1535_v12, %v1535_v12  ;;  %v1538_v25 = vmul.f32 0.5, %v1535_v12 }
 0xfef   :  { %1976 = vtanh.f32 %v1547_v0  ;;  %v1542_v15 = vmul.f32 %v1540_v14, %v1535_v12 }
 0xff1   :  { %v1544_v16 = vmul.f32 0.044715, %v1542_v15 }
 0xff3   :  { %v1546_v13 = vadd.f32 %v1544_v16, %v1535_v12 }
 0xff5   :  { %v1977_v19 = vpop.eup %1976  ;;  %v1548_v17 = vmul.f32 0.7978846, %v1546_v13 }
 0xff6   :  { %v1551_v20 = vadd.f32 1.0, %v1977_v19  ;;  %v1583_v19 = vld [vmem:[%s2694_s8] sm:$0x3]  ;;  %s2031_s8 = smov [#allocation2]  }
 0xff7   :  { %1978 = vtanh.f32 %v1548_v17  ;;  %s1705_s15 = sshll.u32 %s2031_s8, 4  ;;  %s1706_s15 = int_to_ptr.vmem [resolvable:$true] %s1705_s15 }
 0xff8   :  { %v1553_v21 = vmul.f32 %v1551_v20, %v1537_v18 }
 0xffa   :  { %1571 = vmatmul.f32.vlgmr.msrb.gmra.mxu2 %v1553_v21 }
 0xffd   :  { %v1979_v24 = vpop.eup %1978 }
 0xffe   :  { %v1552_v26 = vadd.f32 1.0, %v1979_v24  ;;  %v1660_v24 = vperm.slane %v1583_v19, 0 }
0x1000   :  { %v1554_v27 = vmul.f32 %v1552_v26, %v1538_v25 }
0x1002   :  { %1574 = vmatmul.f32.gmra.mxu2 %v1554_v27 }
0x107d   :  { %v1572_v28 = vpop.f32.mrf.mxu2 }
0x107e   :  { %v1578_v29 = vadd.f32 %v1572_v28, %v2550_v35 }
0x1080   :  { %v1581_v30 = vadd.f32 %v1580_v22, %v1578_v29 }
0x1082   :  { %v1584_v31 = vsel %vm70_vm0, %v1581_v30, 0.0 }
0x1083   :  { %1585 = vadd.xlane.f32.xlu2 %v1584_v31 }
0x1085   :  { %v1575_v32 = vpop.f32.mrf.mxu2 }
0x1086   :  { %v1579_v60 = vadd.f32 %v1575_v32, %v2555_v38 }
0x1088   :  { %v1582_v33 = vadd.f32 %v1580_v22, %v1579_v60  ;;  %v1663_v22 = vperm.slane %v1583_v19, 1 }
0x108a   :  { %v1587_v34 = vsel %vm70_vm0, %v1582_v33, 0.0 }
0x108b   :  { %1588 = vadd.xlane.f32.xlu0 %v1587_v34 }
0x10f6   :  { %v1586_v36 = vpop.xlane.xlu2 %1585 }
0x10f7   :  { %v1590_v62 = vmul.f32 %v1586_v36, %v2102_v10 }
0x10f9   :  { %v2650_v37 = vsub.f32 %v1581_v30, %v1590_v62 }
0x10fb   :  { %v1594_v23 = vmul.f32 %v2650_v37, %v2650_v37 }
0x10fd   :  { %v1596_v35 = vsel %vm70_vm0, %v1594_v23, 0.0 }
0x10fe   :  { %1597 = vadd.xlane.f32.xlu1 %v1596_v35  ;;  %v1589_v39 = vpop.xlane.xlu0 %1588 }
0x10ff   :  { %v1591_v1 = vmul.f32 %v1589_v39, %v2102_v10 }
0x1101   :  { %v2656_v40 = vsub.f32 %v1582_v33, %v1591_v1 }
0x1103   :  { %v1595_v38 = vmul.f32 %v2656_v40, %v2656_v40 }
0x1105   :  { %v1599_v41 = vsel %vm70_vm0, %v1595_v38, 0.0 }
0x1106   :  { %1600 = vadd.xlane.f32.xlu2 %v1599_v41 }
0x1171   :  { %v1598_v46 = vpop.xlane.xlu1 %1597 }
0x1172   :  { %v1602_v48 = vmul.f32 %v1598_v46, %v2102_v10 }
0x1174   :  { %v1604_v47 = vadd.f32 1e-05, %v1602_v48 }
0x1176   :  { %1980 = vrsqrt.f32 %v1604_v47  ;;  %vm1613_vm11 = vcmp.eq.f32.partialorder %v1604_v47, inf  ;;  %v1616_v3 = vand.u32 2147483648, %v1604_v47  ;;  %vm1615_vm12 = vcmp.eq.f32.partialorder %v1604_v47, 0.0 }
0x1179   :  { %v1601_v49 = vpop.xlane.xlu2 %1600 }
0x117a   :  { %v1603_v50 = vmul.f32 %v1601_v49, %v2102_v10 }
0x117c   :  { %v1981_v52 = vpop.eup %1980  ;;  %v1605_v54 = vadd.f32 1e-05, %v1603_v50 }
0x117d   :  { %v1607_v57 = vmul.f32 %v1981_v52, %v1604_v47 }
0x117e   :  { %1982 = vrsqrt.f32 %v1605_v54  ;;  %vm1625_vm13 = vcmp.eq.f32.partialorder %v1605_v54, inf  ;;  %v1628_v8 = vand.u32 2147483648, %v1605_v54  ;;  %vm1627_vm14 = vcmp.eq.f32.partialorder %v1605_v54, 0.0 }
0x117f   :  { %v1608_v44 = vmul.f32 %v1981_v52, %v1607_v57 }
0x1181   :  { %v1609_v53 = vmul.f32 0.5, %v1608_v44 }
0x1183   :  { %v1610_v55 = vsub.f32 1.5, %v1609_v53 }
0x1184   :  { %v1983_v56 = vpop.eup %1982 }
0x1185   :  { %v1611_v59 = vmul.f32 %v1981_v52, %v1610_v55  ;;  %v1619_v2 = vmul.f32 %v1983_v56, %v1605_v54 }
0x1187   :  { %v1612_v63 = vmul.f32 %v1611_v59, %v1604_v47  ;;  %v1620_v58 = vmul.f32 %v1983_v56, %v1619_v2 }
0x1189   :  { %v1614_v61 = vsel %vm1613_vm11, %v1604_v47, %v1612_v63  ;;  %v1621_v4 = vmul.f32 0.5, %v1620_v58 }
0x118a   :  { %v1617_v5 = vsel %vm1615_vm12, %v1616_v3, %v1614_v61 }
0x118b   :  { %v1622_v6 = vsub.f32 1.5, %v1621_v4  ;;  %1984 = vrcp.f32 %v1617_v5  ;;  %v1641_v15 = vand.u32 2147483648, %v1617_v5  ;;  %v1639_v13 = vand.u32 2147483647, %v1617_v5 }
0x118c   :  { %vm1635_vm1 = vweird.f32 %v1617_v5 }
0x118d   :  { %v1623_v10 = vmul.f32 %v1983_v56, %v1622_v6  ;;  %v1642_v20 = vor.u32 1.1754944e-38, %v1641_v15  ;;  %vm1640_vm3 = vcmp.eq.f32.partialorder %v1639_v13, 8.507059e+37 }
0x118f   :  { %v1624_v7 = vmul.f32 %v1623_v10, %v1605_v54 }
0x1191   :  { %v1985_v9 = vpop.eup %1984  ;;  %v1626_v11 = vsel %vm1625_vm13, %v1605_v54, %v1624_v7 }
0x1192   :  { %v1631_v12 = vmul.f32 %v1985_v9, %v1617_v5  ;;  %v1629_v0 = vsel %vm1627_vm14, %v1628_v8, %v1626_v11  ;;  %vm1636_vm15 = vweird.f32 %v1985_v9 }
0x1193   :  { %1986 = vrcp.f32 %v1629_v0  ;;  %vm1637_vm2 = vmor %vm1635_vm1, %vm1636_vm15  ;;  %v1656_v29 = vand.u32 2147483648, %v1629_v0  ;;  %v1654_v32 = vand.u32 2147483647, %v1629_v0  ;;  %vm1650_vm5 = vweird.f32 %v1629_v0 }
0x1194   :  { %v1632_v14 = vsub.f32 1.0, %v1631_v12 }
0x1195   :  { %v1657_v34 = vor.u32 1.1754944e-38, %v1656_v29  ;;  %vm1655_vm7 = vcmp.eq.f32.partialorder %v1654_v32, 8.507059e+37 }
0x1196   :  { %v1633_v16 = vmul.f32 %v1985_v9, %v1632_v14 }
0x1198   :  { %v1634_v17 = vadd.f32 %v1985_v9, %v1633_v16 }
0x1199   :  { %v1987_v18 = vpop.eup %1986 }
0x119a   :  { %v1638_v21 = vsel %vm1637_vm2, %v1985_v9, %v1634_v17  ;;  %v1646_v25 = vmul.f32 %v1987_v18, %v1629_v0  ;;  %vm1651_vm4 = vweird.f32 %v1987_v18 }
0x119b   :  { %v1643_v26 = vsel %vm1640_vm3, %v1642_v20, %v1638_v21  ;;  %vm1652_vm6 = vmor %vm1650_vm5, %vm1651_vm4 }
0x119c   :  { %v1644_v27 = vmul.f32 %v1643_v26, %v2650_v37  ;;  %v1647_v28 = vsub.f32 1.0, %v1646_v25 }
0x119e   :  { %v1661_v30 = vmul.f32 %v1660_v24, %v1644_v27  ;;  %v1648_v31 = vmul.f32 %v1987_v18, %v1647_v28 }
0x11a0   :  { %v1664_v60 = vadd.f32 %v1663_v22, %v1661_v30  ;;  %v1649_v33 = vadd.f32 %v1987_v18, %v1648_v31 }
0x11a2   :  { %1809 = vmatmul.msk.f32.vlgmr.msra.gmra.mxu0 %vm70_vm0, %v1664_v60  ;;  %v1653_v36 = vsel %vm1652_vm6, %v1987_v18, %v1649_v33 }
0x11a3   :  { %v1658_v62 = vsel %vm1655_vm7, %v1657_v34, %v1653_v36 }
0x11a4   :  { %v1659_v23 = vmul.f32 %v1658_v62, %v2656_v40 }
0x11a6   :  { %v1662_v37 = vmul.f32 %v1660_v24, %v1659_v23 }
0x11a8   :  { %v1665_v35 = vadd.f32 %v1663_v22, %v1662_v37 }
0x11aa   :  { %1810 = vmatmul.msk.f32.gmra.mxu0 %vm70_vm0, %v1665_v35 }
0x121f   :  { %v1693_v39 = vpop.f32.mrf.mxu0 }
0x1220   :  { %1699 = vst [vmem:[#allocation2] sm:$0xff] %v1693_v39 }
0x1227   :  { %v1696_v1 = vpop.f32.mrf.mxu0 }
0x1228   :  { %1700 = vst [vmem:[#allocation2 + $0x8] sm:$0xff] %v1696_v1 }
0x1229   :  { %1713 = dma.vmem_to_hbm [thread:$0]  %s1706_s15, 256, %s1708_s20, [#allocation3], %s2032_s22, %s2032_s22, %s2703_s1  }
0x122a   :  { %2014 = dma.done.wait [#allocation3], 256  }
0x122b   :  { %2015 = vsyncadd [#allocation3], 4294967040 }
0x122c   :  { %1718 = vsyncpa [#allocation3], 1 }

</bundles_post_ra>
